<compile_context>
chip_gen: v5e
topology: v5e:2x2
jax: 0.10.0
libtpu: 0.0.40
codegen_flags: <defaults>
</compile_context>

<pallas_src>
import math

import jax
import jax.numpy as jnp
from jax import lax
from jax.experimental import pallas as pl
from jax.experimental.pallas import tpu as pltpu


def _round_up(n, m):
    return ((n + m - 1) // m) * m


def _pick_time_block(T):
    for tt in (32, 16, 8, 4, 2, 1):
        if T % tt == 0:
            return tt
    return 1


def _pick_batch_tile(Bp):
    # Split the (padded) batch into two tiles when big enough -> the leading
    # "parallel" grid axis can be sharded across TensorCores (v7x / megacore).
    if Bp >= 16 and (Bp // 2) % 8 == 0:
        return Bp // 2
    return Bp


def _lstm_kernel(gx_ref, h0_ref, c0_ref, wh_ref, out_ref, hn_ref, cn_ref):
    """One grid step == one (batch-tile, time-block) of the LSTM recurrence.

    gx_ref:  (TT, Bt, 4*Hp)  precomputed x@Wx^T + b for this time block
    h0/c0:   (Bt, Hp)        initial states (read only at time-block 0)
    wh_ref:  (Hp, 4*Hp)      pre-transposed, per-gate-padded recurrent weights
    out_ref: (TT, Bt, Hp)    h_t for each timestep in the block
    hn/cn:   (Bt, Hp)        resident accumulator blocks == the recurrent carry
    """
    TT = gx_ref.shape[0]
    Hp = hn_ref.shape[-1]

    # Initialize the carry from h0/c0 at the first time block of this batch tile.
    @pl.when(pl.program_id(1) == 0)
    def _():
        hn_ref[...] = h0_ref[...]
        cn_ref[...] = c0_ref[...]

    def _sigmoid(z):
        # sigmoid(z) = 0.5*(tanh(0.5*z)+1): one EUP push instead of exp+divide.
        return 0.5 * (jnp.tanh(0.5 * z) + 1.0)

    def step(tt, carry):
        h, c = carry  # f32 carries
        gates = gx_ref[tt] + jnp.dot(
            h.astype(wh_ref.dtype), wh_ref[...],
            preferred_element_type=jnp.float32)
        i_t = _sigmoid(gates[:, 0 * Hp:1 * Hp])
        f_t = _sigmoid(gates[:, 1 * Hp:2 * Hp])
        g_t = jnp.tanh(gates[:, 2 * Hp:3 * Hp])
        o_t = _sigmoid(gates[:, 3 * Hp:4 * Hp])
        c_new = f_t * c + i_t * g_t
        h_new = o_t * jnp.tanh(c_new)
        out_ref[tt] = h_new.astype(out_ref.dtype)
        return h_new, c_new

    h_fin, c_fin = lax.fori_loop(0, TT, step, (hn_ref[...], cn_ref[...]),
                                 unroll=True)
    hn_ref[...] = h_fin
    cn_ref[...] = c_fin


def lstm_forward(x, states, params, *, param_dtype=jnp.bfloat16):
    """Mirrors LSTM.forward: x (B, T, I), states = (h0, c0) each (1, B, H).

    Returns (out (B, T, H), (hn (1, B, H), cn (1, B, H))).
    """
    wx, bx, wh, bh = params  # wx: (4H, I), wh: (4H, H) -- PyTorch Linear layout
    B, T, I = x.shape
    H = wh.shape[1]
    f32 = jnp.float32

    Bp = _round_up(B, 8)        # sublane-aligned batch
    Hp = _round_up(H, 128)      # lane-aligned hidden (per gate)
    TT = _pick_time_block(T)    # timesteps per grid step
    Bt = _pick_batch_tile(Bp)   # batch rows per grid step

    # ---- Hoisted input projection: one big matmul over all B*T rows --------
    b_comb = (bx + bh).astype(f32)                              # (4H,)
    x_flat = x.reshape(B * T, I).astype(param_dtype)
    gx = jnp.dot(x_flat, jnp.transpose(wx).astype(param_dtype),
                 preferred_element_type=f32) + b_comb           # (B*T, 4H)
    # per-gate pad H -> Hp, pad B -> Bp, lay out time-major: (T, Bp, 4*Hp)
    gx = gx.reshape(B, T, 4, H)
    gx = jnp.pad(gx, ((0, Bp - B), (0, 0), (0, 0), (0, Hp - H)))
    gx = jnp.transpose(gx, (1, 0, 2, 3)).reshape(T, Bp, 4 * Hp)

    # ---- Recurrent weights: pre-transposed, per-gate padded ----------------
    wh_t = jnp.transpose(wh).reshape(H, 4, H)                   # (H_in, gate, H_out)
    wh_p = jnp.pad(wh_t, ((0, Hp - H), (0, 0), (0, Hp - H)))
    wh_p = wh_p.reshape(Hp, 4 * Hp).astype(param_dtype)         # (Hp, 4*Hp)

    # ---- Initial states, padded (carries stay f32) --------------------------
    h0 = jnp.pad(states[0][0].astype(f32), ((0, Bp - B), (0, Hp - H)))
    c0 = jnp.pad(states[1][0].astype(f32), ((0, Bp - B), (0, Hp - H)))

    grid = (Bp // Bt, T // TT)  # (batch tiles: parallel, time blocks: serial)

    out_p, hn_p, cn_p = pl.pallas_call(
        _lstm_kernel,
        out_shape=(
            jax.ShapeDtypeStruct((T, Bp, Hp), f32),
            jax.ShapeDtypeStruct((Bp, Hp), f32),
            jax.ShapeDtypeStruct((Bp, Hp), f32),
        ),
        grid_spec=pltpu.PrefetchScalarGridSpec(
            num_scalar_prefetch=0,
            grid=grid,
            in_specs=[
                pl.BlockSpec((TT, Bt, 4 * Hp), lambda b, t: (t, b, 0)),  # gx
                pl.BlockSpec((Bt, Hp), lambda b, t: (b, 0)),             # h0
                pl.BlockSpec((Bt, Hp), lambda b, t: (b, 0)),             # c0
                pl.BlockSpec((Hp, 4 * Hp), lambda b, t: (0, 0)),         # Wh^T
            ],
            out_specs=[
                pl.BlockSpec((TT, Bt, Hp), lambda b, t: (t, b, 0)),      # out
                pl.BlockSpec((Bt, Hp), lambda b, t: (b, 0)),             # hn (carry)
                pl.BlockSpec((Bt, Hp), lambda b, t: (b, 0)),             # cn (carry)
            ],
        ),
        compiler_params=pltpu.CompilerParams(
            # batch tiles are independent; time recurrence is sequential
            dimension_semantics=("parallel", "arbitrary"),
        ),
    )(gx, h0, c0, wh_p)

    out = jnp.transpose(out_p[:, :B, :H], (1, 0, 2))            # (B, T, H)
    hn = hn_p[:B, :H][None, :, :]
    cn = cn_p[:B, :H][None, :, :]
    return out, (hn, cn)


def init_lstm_params(key, input_size, hidden_size):
    """Deterministic init matching nn.Linear default: U(-1/sqrt(fan_in), +)."""
    k1, k2, k3, k4 = jax.random.split(key, 4)
    bound_x = 1.0 / math.sqrt(input_size)
    bound_h = 1.0 / math.sqrt(hidden_size)
    wx = jax.random.uniform(k1, (4 * hidden_size, input_size),
                            minval=-bound_x, maxval=bound_x, dtype=jnp.float32)
    bx = jax.random.uniform(k2, (4 * hidden_size,),
                            minval=-bound_x, maxval=bound_x, dtype=jnp.float32)
    wh = jax.random.uniform(k3, (4 * hidden_size, hidden_size),
                            minval=-bound_h, maxval=bound_h, dtype=jnp.float32)
    bh = jax.random.uniform(k4, (4 * hidden_size,),
                            minval=-bound_h, maxval=bound_h, dtype=jnp.float32)
    return wx, bx, wh, bh


def _reference_lstm(x, states, params):
    """Pure-JAX reference mirroring the PyTorch loop, for a sanity check."""
    wx, bx, wh, bh = params
    h = states[0][0]
    c = states[1][0]
    H = h.shape[1]
    outs = []
    for t in range(x.shape[1]):
        gates = x[:, t, :] @ wx.T + bx + h @ wh.T + bh
        i_t = jax.nn.sigmoid(gates[:, 0 * H:1 * H])
        f_t = jax.nn.sigmoid(gates[:, 1 * H:2 * H])
        g_t = jnp.tanh(gates[:, 2 * H:3 * H])
        o_t = jax.nn.sigmoid(gates[:, 3 * H:4 * H])
        c = f_t * c + i_t * g_t
        h = o_t * jnp.tanh(c)
        outs.append(h)
    return jnp.stack(outs, axis=1), (h[None], c[None])


if __name__ == "__main__":
    batch, seq, input_size, hidden_size = 2, 8, 16, 32

    key = jax.random.PRNGKey(0)
    kx, kh, kc, kp = jax.random.split(key, 4)

    x = jax.random.normal(kx, (batch, seq, input_size), dtype=jnp.float32)
    h0 = jax.random.normal(kh, (1, batch, hidden_size), dtype=jnp.float32)
    c0 = jax.random.normal(kc, (1, batch, hidden_size), dtype=jnp.float32)
    params = init_lstm_params(kp, input_size, hidden_size)

    out_ref, (hn_ref, cn_ref) = _reference_lstm(x, (h0, c0), params)

    # --- f32 precision check (tight tolerance) ------------------------------
    out32, (hn32, cn32) = lstm_forward(x, (h0, c0), params,
                                       param_dtype=jnp.float32)
    out32 = jax.block_until_ready(out32)
    assert out32.shape == (batch, seq, hidden_size)
    assert hn32.shape == (1, batch, hidden_size)
    assert cn32.shape == (1, batch, hidden_size)
    assert jnp.allclose(out32, out_ref, atol=1e-4, rtol=1e-4)
    assert jnp.allclose(hn32, hn_ref, atol=1e-4, rtol=1e-4)
    assert jnp.allclose(cn32, cn_ref, atol=1e-4, rtol=1e-4)

    # --- default fast path: bf16 matmul operands (looser tolerance) ---------
    out, (hn, cn) = lstm_forward(x, (h0, c0), params)
    out = jax.block_until_ready(out)
    hn = jax.block_until_ready(hn)
    cn = jax.block_until_ready(cn)
    assert out.shape == (batch, seq, hidden_size)
    assert hn.shape == (1, batch, hidden_size)
    assert cn.shape == (1, batch, hidden_size)
    assert jnp.allclose(out, out_ref, atol=1e-1, rtol=1e-1)
    assert jnp.allclose(hn, hn_ref, atol=1e-1, rtol=1e-1)
    assert jnp.allclose(cn, cn_ref, atol=1e-1, rtol=1e-1)

    print("KERNEL_OK")
</pallas_src>

<mosaic_0001>
module attributes {stable_mosaic.version = 11 : i64} {
  func.func @_lstm_kernel(%arg0: i32, %arg1: i32, %arg2: memref<8x8x512xf32, #tpu.memory_space<vmem>>, %arg3: memref<8x128xf32, #tpu.memory_space<vmem>>, %arg4: memref<8x128xf32, #tpu.memory_space<vmem>>, %arg5: memref<128x512xf32, #tpu.memory_space<vmem>>, %arg6: memref<8x8x128xf32, #tpu.memory_space<vmem>>, %arg7: memref<8x128xf32, #tpu.memory_space<vmem>>, %arg8: memref<8x128xf32, #tpu.memory_space<vmem>>) attributes {dimension_semantics = [#tpu.dimension_semantics<parallel>, #tpu.dimension_semantics<arbitrary>], iteration_bounds = array<i64: 1, 1>, scalar_prefetch = 0 : i64, scratch_operands = 0 : i64, tpu.core_type = #tpu.core_type<tc>, window_params = [{transform_indices = @transform_0, window_bounds = array<i64: 8, 8, 512>}, {transform_indices = @transform_1, window_bounds = array<i64: 8, 128>}, {transform_indices = @transform_2, window_bounds = array<i64: 8, 128>}, {pipeline_mode = #tpu.pipeline_mode<synchronous>, transform_indices = @transform_3, window_bounds = array<i64: 128, 512>}, {transform_indices = @transform_4, window_bounds = array<i64: 8, 8, 128>}, {transform_indices = @transform_5, window_bounds = array<i64: 8, 128>}, {transform_indices = @transform_6, window_bounds = array<i64: 8, 128>}]} {
    %c0_i32 = arith.constant 0 : i32
    %0 = arith.cmpi eq, %arg1, %c0_i32 : i32
    %1 = arith.extui %0 : i1 to i32
    %c0_i32_0 = arith.constant 0 : i32
    %2 = arith.cmpi ne, %1, %c0_i32_0 : i32
    scf.if %2 {
      %c0_136 = arith.constant 0 : index
      %c0_137 = arith.constant 0 : index
      %335 = vector.load %arg3[%c0_136, %c0_137] : memref<8x128xf32, #tpu.memory_space<vmem>>, vector<8x128xf32>
      %c0_138 = arith.constant 0 : index
      %c0_139 = arith.constant 0 : index
      %336 = vector.load %arg7[%c0_138, %c0_139] : memref<8x128xf32, #tpu.memory_space<vmem>>, vector<8x128xf32>
      tpu.vector_store %arg7[%c0_138, %c0_139], %335 {strides = array<i32>} : memref<8x128xf32, #tpu.memory_space<vmem>>, vector<8x128xf32>,
      %c0_140 = arith.constant 0 : index
      %c0_141 = arith.constant 0 : index
      %337 = vector.load %arg4[%c0_140, %c0_141] : memref<8x128xf32, #tpu.memory_space<vmem>>, vector<8x128xf32>
      %c0_142 = arith.constant 0 : index
      %c0_143 = arith.constant 0 : index
      %338 = vector.load %arg8[%c0_142, %c0_143] : memref<8x128xf32, #tpu.memory_space<vmem>>, vector<8x128xf32>
      tpu.vector_store %arg8[%c0_142, %c0_143], %337 {strides = array<i32>} : memref<8x128xf32, #tpu.memory_space<vmem>>, vector<8x128xf32>,
    } else {
    }
    %c0 = arith.constant 0 : index
    %c0_1 = arith.constant 0 : index
    %3 = vector.load %arg7[%c0, %c0_1] : memref<8x128xf32, #tpu.memory_space<vmem>>, vector<8x128xf32>
    %c0_2 = arith.constant 0 : index
    %c0_3 = arith.constant 0 : index
    %4 = vector.load %arg8[%c0_2, %c0_3] : memref<8x128xf32, #tpu.memory_space<vmem>>, vector<8x128xf32>
    %c0_i32_4 = arith.constant 0 : i32
    %5 = arith.index_cast %c0_i32_4 : i32 to index
    %c0_5 = arith.constant 0 : index
    %c0_6 = arith.constant 0 : index
    %6 = vector.load %arg2[%5, %c0_5, %c0_6] : memref<8x8x512xf32, #tpu.memory_space<vmem>>, vector<1x8x512xf32>
    %7 = vector.shape_cast %6 : vector<1x8x512xf32> to vector<8x512xf32>
    %c0_7 = arith.constant 0 : index
    %c0_8 = arith.constant 0 : index
    %8 = vector.load %arg5[%c0_7, %c0_8] : memref<128x512xf32, #tpu.memory_space<vmem>>, vector<128x512xf32>
    %cst = arith.constant dense<0.000000e+00> : vector<8x512xf32>
    %9 = tpu.matmul %3, %8, %cst {dimension_numbers = #tpu.dot_dimension_numbers<[1], [0], [0], [1], [0, 0, 1, 1], [], []>} : vector<8x128xf32>, vector<128x512xf32>, vector<8x512xf32> -> vector<8x512xf32>
    %10 = arith.addf %7, %9 : vector<8x512xf32>
    %11 = vector.extract_strided_slice %10 {offsets = [0, 0], sizes = [8, 128], strides = [1, 1]} : vector<8x512xf32> to vector<8x128xf32>
    %cst_9 = arith.constant 5.000000e-01 : f32
    %12 = vector.broadcast %cst_9 : f32 to vector<8x128xf32>
    %13 = arith.mulf %12, %11 : vector<8x128xf32>
    %14 = math.tanh %13 : vector<8x128xf32>
    %cst_10 = arith.constant 1.000000e+00 : f32
    %15 = vector.broadcast %cst_10 : f32 to vector<8x128xf32>
    %16 = arith.addf %14, %15 : vector<8x128xf32>
    %cst_11 = arith.constant 5.000000e-01 : f32
    %17 = vector.broadcast %cst_11 : f32 to vector<8x128xf32>
    %18 = arith.mulf %17, %16 : vector<8x128xf32>
    %19 = vector.extract_strided_slice %10 {offsets = [0, 128], sizes = [8, 128], strides = [1, 1]} : vector<8x512xf32> to vector<8x128xf32>
    %cst_12 = arith.constant 5.000000e-01 : f32
    %20 = vector.broadcast %cst_12 : f32 to vector<8x128xf32>
    %21 = arith.mulf %20, %19 : vector<8x128xf32>
    %22 = math.tanh %21 : vector<8x128xf32>
    %cst_13 = arith.constant 1.000000e+00 : f32
    %23 = vector.broadcast %cst_13 : f32 to vector<8x128xf32>
    %24 = arith.addf %22, %23 : vector<8x128xf32>
    %cst_14 = arith.constant 5.000000e-01 : f32
    %25 = vector.broadcast %cst_14 : f32 to vector<8x128xf32>
    %26 = arith.mulf %25, %24 : vector<8x128xf32>
    %27 = vector.extract_strided_slice %10 {offsets = [0, 256], sizes = [8, 128], strides = [1, 1]} : vector<8x512xf32> to vector<8x128xf32>
    %28 = math.tanh %27 : vector<8x128xf32>
    %29 = vector.extract_strided_slice %10 {offsets = [0, 384], sizes = [8, 128], strides = [1, 1]} : vector<8x512xf32> to vector<8x128xf32>
    %cst_15 = arith.constant 5.000000e-01 : f32
    %30 = vector.broadcast %cst_15 : f32 to vector<8x128xf32>
    %31 = arith.mulf %30, %29 : vector<8x128xf32>
    %32 = math.tanh %31 : vector<8x128xf32>
    %cst_16 = arith.constant 1.000000e+00 : f32
    %33 = vector.broadcast %cst_16 : f32 to vector<8x128xf32>
    %34 = arith.addf %32, %33 : vector<8x128xf32>
    %cst_17 = arith.constant 5.000000e-01 : f32
    %35 = vector.broadcast %cst_17 : f32 to vector<8x128xf32>
    %36 = arith.mulf %35, %34 : vector<8x128xf32>
    %37 = arith.mulf %26, %4 : vector<8x128xf32>
    %38 = arith.mulf %18, %28 : vector<8x128xf32>
    %39 = arith.addf %37, %38 : vector<8x128xf32>
    %40 = math.tanh %39 : vector<8x128xf32>
    %41 = arith.mulf %36, %40 : vector<8x128xf32>
    %42 = arith.index_cast %c0_i32_4 : i32 to index
    %c0_18 = arith.constant 0 : index
    %c0_19 = arith.constant 0 : index
    %43 = vector.load %arg6[%42, %c0_18, %c0_19] : memref<8x8x128xf32, #tpu.memory_space<vmem>>, vector<1x8x128xf32>
    %44 = vector.shape_cast %43 : vector<1x8x128xf32> to vector<8x128xf32>
    %45 = vector.shape_cast %41 : vector<8x128xf32> to vector<1x8x128xf32>
    tpu.vector_store %arg6[%42, %c0_18, %c0_19], %45 {strides = array<i32>} : memref<8x8x128xf32, #tpu.memory_space<vmem>>, vector<1x8x128xf32>,
    %c1_i32 = arith.constant 1 : i32
    %46 = arith.index_cast %c1_i32 : i32 to index
    %c0_20 = arith.constant 0 : index
    %c0_21 = arith.constant 0 : index
    %47 = vector.load %arg2[%46, %c0_20, %c0_21] : memref<8x8x512xf32, #tpu.memory_space<vmem>>, vector<1x8x512xf32>
    %48 = vector.shape_cast %47 : vector<1x8x512xf32> to vector<8x512xf32>
    %c0_22 = arith.constant 0 : index
    %c0_23 = arith.constant 0 : index
    %49 = vector.load %arg5[%c0_22, %c0_23] : memref<128x512xf32, #tpu.memory_space<vmem>>, vector<128x512xf32>
    %cst_24 = arith.constant dense<0.000000e+00> : vector<8x512xf32>
    %50 = tpu.matmul %41, %49, %cst_24 {dimension_numbers = #tpu.dot_dimension_numbers<[1], [0], [0], [1], [0, 0, 1, 1], [], []>} : vector<8x128xf32>, vector<128x512xf32>, vector<8x512xf32> -> vector<8x512xf32>
    %51 = arith.addf %48, %50 : vector<8x512xf32>
    %52 = vector.extract_strided_slice %51 {offsets = [0, 0], sizes = [8, 128], strides = [1, 1]} : vector<8x512xf32> to vector<8x128xf32>
    %cst_25 = arith.constant 5.000000e-01 : f32
    %53 = vector.broadcast %cst_25 : f32 to vector<8x128xf32>
    %54 = arith.mulf %53, %52 : vector<8x128xf32>
    %55 = math.tanh %54 : vector<8x128xf32>
    %cst_26 = arith.constant 1.000000e+00 : f32
    %56 = vector.broadcast %cst_26 : f32 to vector<8x128xf32>
    %57 = arith.addf %55, %56 : vector<8x128xf32>
    %cst_27 = arith.constant 5.000000e-01 : f32
    %58 = vector.broadcast %cst_27 : f32 to vector<8x128xf32>
    %59 = arith.mulf %58, %57 : vector<8x128xf32>
    %60 = vector.extract_strided_slice %51 {offsets = [0, 128], sizes = [8, 128], strides = [1, 1]} : vector<8x512xf32> to vector<8x128xf32>
    %cst_28 = arith.constant 5.000000e-01 : f32
    %61 = vector.broadcast %cst_28 : f32 to vector<8x128xf32>
    %62 = arith.mulf %61, %60 : vector<8x128xf32>
    %63 = math.tanh %62 : vector<8x128xf32>
    %cst_29 = arith.constant 1.000000e+00 : f32
    %64 = vector.broadcast %cst_29 : f32 to vector<8x128xf32>
    %65 = arith.addf %63, %64 : vector<8x128xf32>
    %cst_30 = arith.constant 5.000000e-01 : f32
    %66 = vector.broadcast %cst_30 : f32 to vector<8x128xf32>
    %67 = arith.mulf %66, %65 : vector<8x128xf32>
    %68 = vector.extract_strided_slice %51 {offsets = [0, 256], sizes = [8, 128], strides = [1, 1]} : vector<8x512xf32> to vector<8x128xf32>
    %69 = math.tanh %68 : vector<8x128xf32>
    %70 = vector.extract_strided_slice %51 {offsets = [0, 384], sizes = [8, 128], strides = [1, 1]} : vector<8x512xf32> to vector<8x128xf32>
    %cst_31 = arith.constant 5.000000e-01 : f32
    %71 = vector.broadcast %cst_31 : f32 to vector<8x128xf32>
    %72 = arith.mulf %71, %70 : vector<8x128xf32>
    %73 = math.tanh %72 : vector<8x128xf32>
    %cst_32 = arith.constant 1.000000e+00 : f32
    %74 = vector.broadcast %cst_32 : f32 to vector<8x128xf32>
    %75 = arith.addf %73, %74 : vector<8x128xf32>
    %cst_33 = arith.constant 5.000000e-01 : f32
    %76 = vector.broadcast %cst_33 : f32 to vector<8x128xf32>
    %77 = arith.mulf %76, %75 : vector<8x128xf32>
    %78 = arith.mulf %67, %39 : vector<8x128xf32>
    %79 = arith.mulf %59, %69 : vector<8x128xf32>
    %80 = arith.addf %78, %79 : vector<8x128xf32>
    %81 = math.tanh %80 : vector<8x128xf32>
    %82 = arith.mulf %77, %81 : vector<8x128xf32>
    %83 = arith.index_cast %c1_i32 : i32 to index
    %c0_34 = arith.constant 0 : index
    %c0_35 = arith.constant 0 : index
    %84 = vector.load %arg6[%83, %c0_34, %c0_35] : memref<8x8x128xf32, #tpu.memory_space<vmem>>, vector<1x8x128xf32>
    %85 = vector.shape_cast %84 : vector<1x8x128xf32> to vector<8x128xf32>
    %86 = vector.shape_cast %82 : vector<8x128xf32> to vector<1x8x128xf32>
    tpu.vector_store %arg6[%83, %c0_34, %c0_35], %86 {strides = array<i32>} : memref<8x8x128xf32, #tpu.memory_space<vmem>>, vector<1x8x128xf32>,
    %c2_i32 = arith.constant 2 : i32
    %87 = arith.index_cast %c2_i32 : i32 to index
    %c0_36 = arith.constant 0 : index
    %c0_37 = arith.constant 0 : index
    %88 = vector.load %arg2[%87, %c0_36, %c0_37] : memref<8x8x512xf32, #tpu.memory_space<vmem>>, vector<1x8x512xf32>
    %89 = vector.shape_cast %88 : vector<1x8x512xf32> to vector<8x512xf32>
    %c0_38 = arith.constant 0 : index
    %c0_39 = arith.constant 0 : index
    %90 = vector.load %arg5[%c0_38, %c0_39] : memref<128x512xf32, #tpu.memory_space<vmem>>, vector<128x512xf32>
    %cst_40 = arith.constant dense<0.000000e+00> : vector<8x512xf32>
    %91 = tpu.matmul %82, %90, %cst_40 {dimension_numbers = #tpu.dot_dimension_numbers<[1], [0], [0], [1], [0, 0, 1, 1], [], []>} : vector<8x128xf32>, vector<128x512xf32>, vector<8x512xf32> -> vector<8x512xf32>
    %92 = arith.addf %89, %91 : vector<8x512xf32>
    %93 = vector.extract_strided_slice %92 {offsets = [0, 0], sizes = [8, 128], strides = [1, 1]} : vector<8x512xf32> to vector<8x128xf32>
    %cst_41 = arith.constant 5.000000e-01 : f32
    %94 = vector.broadcast %cst_41 : f32 to vector<8x128xf32>
    %95 = arith.mulf %94, %93 : vector<8x128xf32>
    %96 = math.tanh %95 : vector<8x128xf32>
    %cst_42 = arith.constant 1.000000e+00 : f32
    %97 = vector.broadcast %cst_42 : f32 to vector<8x128xf32>
    %98 = arith.addf %96, %97 : vector<8x128xf32>
    %cst_43 = arith.constant 5.000000e-01 : f32
    %99 = vector.broadcast %cst_43 : f32 to vector<8x128xf32>
    %100 = arith.mulf %99, %98 : vector<8x128xf32>
    %101 = vector.extract_strided_slice %92 {offsets = [0, 128], sizes = [8, 128], strides = [1, 1]} : vector<8x512xf32> to vector<8x128xf32>
    %cst_44 = arith.constant 5.000000e-01 : f32
    %102 = vector.broadcast %cst_44 : f32 to vector<8x128xf32>
    %103 = arith.mulf %102, %101 : vector<8x128xf32>
    %104 = math.tanh %103 : vector<8x128xf32>
    %cst_45 = arith.constant 1.000000e+00 : f32
    %105 = vector.broadcast %cst_45 : f32 to vector<8x128xf32>
    %106 = arith.addf %104, %105 : vector<8x128xf32>
    %cst_46 = arith.constant 5.000000e-01 : f32
    %107 = vector.broadcast %cst_46 : f32 to vector<8x128xf32>
    %108 = arith.mulf %107, %106 : vector<8x128xf32>
    %109 = vector.extract_strided_slice %92 {offsets = [0, 256], sizes = [8, 128], strides = [1, 1]} : vector<8x512xf32> to vector<8x128xf32>
    %110 = math.tanh %109 : vector<8x128xf32>
    %111 = vector.extract_strided_slice %92 {offsets = [0, 384], sizes = [8, 128], strides = [1, 1]} : vector<8x512xf32> to vector<8x128xf32>
    %cst_47 = arith.constant 5.000000e-01 : f32
    %112 = vector.broadcast %cst_47 : f32 to vector<8x128xf32>
    %113 = arith.mulf %112, %111 : vector<8x128xf32>
    %114 = math.tanh %113 : vector<8x128xf32>
    %cst_48 = arith.constant 1.000000e+00 : f32
    %115 = vector.broadcast %cst_48 : f32 to vector<8x128xf32>
    %116 = arith.addf %114, %115 : vector<8x128xf32>
    %cst_49 = arith.constant 5.000000e-01 : f32
    %117 = vector.broadcast %cst_49 : f32 to vector<8x128xf32>
    %118 = arith.mulf %117, %116 : vector<8x128xf32>
    %119 = arith.mulf %108, %80 : vector<8x128xf32>
    %120 = arith.mulf %100, %110 : vector<8x128xf32>
    %121 = arith.addf %119, %120 : vector<8x128xf32>
    %122 = math.tanh %121 : vector<8x128xf32>
    %123 = arith.mulf %118, %122 : vector<8x128xf32>
    %124 = arith.index_cast %c2_i32 : i32 to index
    %c0_50 = arith.constant 0 : index
    %c0_51 = arith.constant 0 : index
    %125 = vector.load %arg6[%124, %c0_50, %c0_51] : memref<8x8x128xf32, #tpu.memory_space<vmem>>, vector<1x8x128xf32>
    %126 = vector.shape_cast %125 : vector<1x8x128xf32> to vector<8x128xf32>
    %127 = vector.shape_cast %123 : vector<8x128xf32> to vector<1x8x128xf32>
    tpu.vector_store %arg6[%124, %c0_50, %c0_51], %127 {strides = array<i32>} : memref<8x8x128xf32, #tpu.memory_space<vmem>>, vector<1x8x128xf32>,
    %c3_i32 = arith.constant 3 : i32
    %128 = arith.index_cast %c3_i32 : i32 to index
    %c0_52 = arith.constant 0 : index
    %c0_53 = arith.constant 0 : index
    %129 = vector.load %arg2[%128, %c0_52, %c0_53] : memref<8x8x512xf32, #tpu.memory_space<vmem>>, vector<1x8x512xf32>
    %130 = vector.shape_cast %129 : vector<1x8x512xf32> to vector<8x512xf32>
    %c0_54 = arith.constant 0 : index
    %c0_55 = arith.constant 0 : index
    %131 = vector.load %arg5[%c0_54, %c0_55] : memref<128x512xf32, #tpu.memory_space<vmem>>, vector<128x512xf32>
    %cst_56 = arith.constant dense<0.000000e+00> : vector<8x512xf32>
    %132 = tpu.matmul %123, %131, %cst_56 {dimension_numbers = #tpu.dot_dimension_numbers<[1], [0], [0], [1], [0, 0, 1, 1], [], []>} : vector<8x128xf32>, vector<128x512xf32>, vector<8x512xf32> -> vector<8x512xf32>
    %133 = arith.addf %130, %132 : vector<8x512xf32>
    %134 = vector.extract_strided_slice %133 {offsets = [0, 0], sizes = [8, 128], strides = [1, 1]} : vector<8x512xf32> to vector<8x128xf32>
    %cst_57 = arith.constant 5.000000e-01 : f32
    %135 = vector.broadcast %cst_57 : f32 to vector<8x128xf32>
    %136 = arith.mulf %135, %134 : vector<8x128xf32>
    %137 = math.tanh %136 : vector<8x128xf32>
    %cst_58 = arith.constant 1.000000e+00 : f32
    %138 = vector.broadcast %cst_58 : f32 to vector<8x128xf32>
    %139 = arith.addf %137, %138 : vector<8x128xf32>
    %cst_59 = arith.constant 5.000000e-01 : f32
    %140 = vector.broadcast %cst_59 : f32 to vector<8x128xf32>
    %141 = arith.mulf %140, %139 : vector<8x128xf32>
    %142 = vector.extract_strided_slice %133 {offsets = [0, 128], sizes = [8, 128], strides = [1, 1]} : vector<8x512xf32> to vector<8x128xf32>
    %cst_60 = arith.constant 5.000000e-01 : f32
    %143 = vector.broadcast %cst_60 : f32 to vector<8x128xf32>
    %144 = arith.mulf %143, %142 : vector<8x128xf32>
    %145 = math.tanh %144 : vector<8x128xf32>
    %cst_61 = arith.constant 1.000000e+00 : f32
    %146 = vector.broadcast %cst_61 : f32 to vector<8x128xf32>
    %147 = arith.addf %145, %146 : vector<8x128xf32>
    %cst_62 = arith.constant 5.000000e-01 : f32
    %148 = vector.broadcast %cst_62 : f32 to vector<8x128xf32>
    %149 = arith.mulf %148, %147 : vector<8x128xf32>
    %150 = vector.extract_strided_slice %133 {offsets = [0, 256], sizes = [8, 128], strides = [1, 1]} : vector<8x512xf32> to vector<8x128xf32>
    %151 = math.tanh %150 : vector<8x128xf32>
    %152 = vector.extract_strided_slice %133 {offsets = [0, 384], sizes = [8, 128], strides = [1, 1]} : vector<8x512xf32> to vector<8x128xf32>
    %cst_63 = arith.constant 5.000000e-01 : f32
    %153 = vector.broadcast %cst_63 : f32 to vector<8x128xf32>
    %154 = arith.mulf %153, %152 : vector<8x128xf32>
    %155 = math.tanh %154 : vector<8x128xf32>
    %cst_64 = arith.constant 1.000000e+00 : f32
    %156 = vector.broadcast %cst_64 : f32 to vector<8x128xf32>
    %157 = arith.addf %155, %156 : vector<8x128xf32>
    %cst_65 = arith.constant 5.000000e-01 : f32
    %158 = vector.broadcast %cst_65 : f32 to vector<8x128xf32>
    %159 = arith.mulf %158, %157 : vector<8x128xf32>
    %160 = arith.mulf %149, %121 : vector<8x128xf32>
    %161 = arith.mulf %141, %151 : vector<8x128xf32>
    %162 = arith.addf %160, %161 : vector<8x128xf32>
    %163 = math.tanh %162 : vector<8x128xf32>
    %164 = arith.mulf %159, %163 : vector<8x128xf32>
    %165 = arith.index_cast %c3_i32 : i32 to index
    %c0_66 = arith.constant 0 : index
    %c0_67 = arith.constant 0 : index
    %166 = vector.load %arg6[%165, %c0_66, %c0_67] : memref<8x8x128xf32, #tpu.memory_space<vmem>>, vector<1x8x128xf32>
    %167 = vector.shape_cast %166 : vector<1x8x128xf32> to vector<8x128xf32>
    %168 = vector.shape_cast %164 : vector<8x128xf32> to vector<1x8x128xf32>
    tpu.vector_store %arg6[%165, %c0_66, %c0_67], %168 {strides = array<i32>} : memref<8x8x128xf32, #tpu.memory_space<vmem>>, vector<1x8x128xf32>,
    %c4_i32 = arith.constant 4 : i32
    %169 = arith.index_cast %c4_i32 : i32 to index
    %c0_68 = arith.constant 0 : index
    %c0_69 = arith.constant 0 : index
    %170 = vector.load %arg2[%169, %c0_68, %c0_69] : memref<8x8x512xf32, #tpu.memory_space<vmem>>, vector<1x8x512xf32>
    %171 = vector.shape_cast %170 : vector<1x8x512xf32> to vector<8x512xf32>
    %c0_70 = arith.constant 0 : index
    %c0_71 = arith.constant 0 : index
    %172 = vector.load %arg5[%c0_70, %c0_71] : memref<128x512xf32, #tpu.memory_space<vmem>>, vector<128x512xf32>
    %cst_72 = arith.constant dense<0.000000e+00> : vector<8x512xf32>
    %173 = tpu.matmul %164, %172, %cst_72 {dimension_numbers = #tpu.dot_dimension_numbers<[1], [0], [0], [1], [0, 0, 1, 1], [], []>} : vector<8x128xf32>, vector<128x512xf32>, vector<8x512xf32> -> vector<8x512xf32>
    %174 = arith.addf %171, %173 : vector<8x512xf32>
    %175 = vector.extract_strided_slice %174 {offsets = [0, 0], sizes = [8, 128], strides = [1, 1]} : vector<8x512xf32> to vector<8x128xf32>
    %cst_73 = arith.constant 5.000000e-01 : f32
    %176 = vector.broadcast %cst_73 : f32 to vector<8x128xf32>
    %177 = arith.mulf %176, %175 : vector<8x128xf32>
    %178 = math.tanh %177 : vector<8x128xf32>
    %cst_74 = arith.constant 1.000000e+00 : f32
    %179 = vector.broadcast %cst_74 : f32 to vector<8x128xf32>
    %180 = arith.addf %178, %179 : vector<8x128xf32>
    %cst_75 = arith.constant 5.000000e-01 : f32
    %181 = vector.broadcast %cst_75 : f32 to vector<8x128xf32>
    %182 = arith.mulf %181, %180 : vector<8x128xf32>
    %183 = vector.extract_strided_slice %174 {offsets = [0, 128], sizes = [8, 128], strides = [1, 1]} : vector<8x512xf32> to vector<8x128xf32>
    %cst_76 = arith.constant 5.000000e-01 : f32
    %184 = vector.broadcast %cst_76 : f32 to vector<8x128xf32>
    %185 = arith.mulf %184, %183 : vector<8x128xf32>
    %186 = math.tanh %185 : vector<8x128xf32>
    %cst_77 = arith.constant 1.000000e+00 : f32
    %187 = vector.broadcast %cst_77 : f32 to vector<8x128xf32>
    %188 = arith.addf %186, %187 : vector<8x128xf32>
    %cst_78 = arith.constant 5.000000e-01 : f32
    %189 = vector.broadcast %cst_78 : f32 to vector<8x128xf32>
    %190 = arith.mulf %189, %188 : vector<8x128xf32>
    %191 = vector.extract_strided_slice %174 {offsets = [0, 256], sizes = [8, 128], strides = [1, 1]} : vector<8x512xf32> to vector<8x128xf32>
    %192 = math.tanh %191 : vector<8x128xf32>
    %193 = vector.extract_strided_slice %174 {offsets = [0, 384], sizes = [8, 128], strides = [1, 1]} : vector<8x512xf32> to vector<8x128xf32>
    %cst_79 = arith.constant 5.000000e-01 : f32
    %194 = vector.broadcast %cst_79 : f32 to vector<8x128xf32>
    %195 = arith.mulf %194, %193 : vector<8x128xf32>
    %196 = math.tanh %195 : vector<8x128xf32>
    %cst_80 = arith.constant 1.000000e+00 : f32
    %197 = vector.broadcast %cst_80 : f32 to vector<8x128xf32>
    %198 = arith.addf %196, %197 : vector<8x128xf32>
    %cst_81 = arith.constant 5.000000e-01 : f32
    %199 = vector.broadcast %cst_81 : f32 to vector<8x128xf32>
    %200 = arith.mulf %199, %198 : vector<8x128xf32>
    %201 = arith.mulf %190, %162 : vector<8x128xf32>
    %202 = arith.mulf %182, %192 : vector<8x128xf32>
    %203 = arith.addf %201, %202 : vector<8x128xf32>
    %204 = math.tanh %203 : vector<8x128xf32>
    %205 = arith.mulf %200, %204 : vector<8x128xf32>
    %206 = arith.index_cast %c4_i32 : i32 to index
    %c0_82 = arith.constant 0 : index
    %c0_83 = arith.constant 0 : index
    %207 = vector.load %arg6[%206, %c0_82, %c0_83] : memref<8x8x128xf32, #tpu.memory_space<vmem>>, vector<1x8x128xf32>
    %208 = vector.shape_cast %207 : vector<1x8x128xf32> to vector<8x128xf32>
    %209 = vector.shape_cast %205 : vector<8x128xf32> to vector<1x8x128xf32>
    tpu.vector_store %arg6[%206, %c0_82, %c0_83], %209 {strides = array<i32>} : memref<8x8x128xf32, #tpu.memory_space<vmem>>, vector<1x8x128xf32>,
    %c5_i32 = arith.constant 5 : i32
    %210 = arith.index_cast %c5_i32 : i32 to index
    %c0_84 = arith.constant 0 : index
    %c0_85 = arith.constant 0 : index
    %211 = vector.load %arg2[%210, %c0_84, %c0_85] : memref<8x8x512xf32, #tpu.memory_space<vmem>>, vector<1x8x512xf32>
    %212 = vector.shape_cast %211 : vector<1x8x512xf32> to vector<8x512xf32>
    %c0_86 = arith.constant 0 : index
    %c0_87 = arith.constant 0 : index
    %213 = vector.load %arg5[%c0_86, %c0_87] : memref<128x512xf32, #tpu.memory_space<vmem>>, vector<128x512xf32>
    %cst_88 = arith.constant dense<0.000000e+00> : vector<8x512xf32>
    %214 = tpu.matmul %205, %213, %cst_88 {dimension_numbers = #tpu.dot_dimension_numbers<[1], [0], [0], [1], [0, 0, 1, 1], [], []>} : vector<8x128xf32>, vector<128x512xf32>, vector<8x512xf32> -> vector<8x512xf32>
    %215 = arith.addf %212, %214 : vector<8x512xf32>
    %216 = vector.extract_strided_slice %215 {offsets = [0, 0], sizes = [8, 128], strides = [1, 1]} : vector<8x512xf32> to vector<8x128xf32>
    %cst_89 = arith.constant 5.000000e-01 : f32
    %217 = vector.broadcast %cst_89 : f32 to vector<8x128xf32>
    %218 = arith.mulf %217, %216 : vector<8x128xf32>
    %219 = math.tanh %218 : vector<8x128xf32>
    %cst_90 = arith.constant 1.000000e+00 : f32
    %220 = vector.broadcast %cst_90 : f32 to vector<8x128xf32>
    %221 = arith.addf %219, %220 : vector<8x128xf32>
    %cst_91 = arith.constant 5.000000e-01 : f32
    %222 = vector.broadcast %cst_91 : f32 to vector<8x128xf32>
    %223 = arith.mulf %222, %221 : vector<8x128xf32>
    %224 = vector.extract_strided_slice %215 {offsets = [0, 128], sizes = [8, 128], strides = [1, 1]} : vector<8x512xf32> to vector<8x128xf32>
    %cst_92 = arith.constant 5.000000e-01 : f32
    %225 = vector.broadcast %cst_92 : f32 to vector<8x128xf32>
    %226 = arith.mulf %225, %224 : vector<8x128xf32>
    %227 = math.tanh %226 : vector<8x128xf32>
    %cst_93 = arith.constant 1.000000e+00 : f32
    %228 = vector.broadcast %cst_93 : f32 to vector<8x128xf32>
    %229 = arith.addf %227, %228 : vector<8x128xf32>
    %cst_94 = arith.constant 5.000000e-01 : f32
    %230 = vector.broadcast %cst_94 : f32 to vector<8x128xf32>
    %231 = arith.mulf %230, %229 : vector<8x128xf32>
    %232 = vector.extract_strided_slice %215 {offsets = [0, 256], sizes = [8, 128], strides = [1, 1]} : vector<8x512xf32> to vector<8x128xf32>
    %233 = math.tanh %232 : vector<8x128xf32>
    %234 = vector.extract_strided_slice %215 {offsets = [0, 384], sizes = [8, 128], strides = [1, 1]} : vector<8x512xf32> to vector<8x128xf32>
    %cst_95 = arith.constant 5.000000e-01 : f32
    %235 = vector.broadcast %cst_95 : f32 to vector<8x128xf32>
    %236 = arith.mulf %235, %234 : vector<8x128xf32>
    %237 = math.tanh %236 : vector<8x128xf32>
    %cst_96 = arith.constant 1.000000e+00 : f32
    %238 = vector.broadcast %cst_96 : f32 to vector<8x128xf32>
    %239 = arith.addf %237, %238 : vector<8x128xf32>
    %cst_97 = arith.constant 5.000000e-01 : f32
    %240 = vector.broadcast %cst_97 : f32 to vector<8x128xf32>
    %241 = arith.mulf %240, %239 : vector<8x128xf32>
    %242 = arith.mulf %231, %203 : vector<8x128xf32>
    %243 = arith.mulf %223, %233 : vector<8x128xf32>
    %244 = arith.addf %242, %243 : vector<8x128xf32>
    %245 = math.tanh %244 : vector<8x128xf32>
    %246 = arith.mulf %241, %245 : vector<8x128xf32>
    %247 = arith.index_cast %c5_i32 : i32 to index
    %c0_98 = arith.constant 0 : index
    %c0_99 = arith.constant 0 : index
    %248 = vector.load %arg6[%247, %c0_98, %c0_99] : memref<8x8x128xf32, #tpu.memory_space<vmem>>, vector<1x8x128xf32>
    %249 = vector.shape_cast %248 : vector<1x8x128xf32> to vector<8x128xf32>
    %250 = vector.shape_cast %246 : vector<8x128xf32> to vector<1x8x128xf32>
    tpu.vector_store %arg6[%247, %c0_98, %c0_99], %250 {strides = array<i32>} : memref<8x8x128xf32, #tpu.memory_space<vmem>>, vector<1x8x128xf32>,
    %c6_i32 = arith.constant 6 : i32
    %251 = arith.index_cast %c6_i32 : i32 to index
    %c0_100 = arith.constant 0 : index
    %c0_101 = arith.constant 0 : index
    %252 = vector.load %arg2[%251, %c0_100, %c0_101] : memref<8x8x512xf32, #tpu.memory_space<vmem>>, vector<1x8x512xf32>
    %253 = vector.shape_cast %252 : vector<1x8x512xf32> to vector<8x512xf32>
    %c0_102 = arith.constant 0 : index
    %c0_103 = arith.constant 0 : index
    %254 = vector.load %arg5[%c0_102, %c0_103] : memref<128x512xf32, #tpu.memory_space<vmem>>, vector<128x512xf32>
    %cst_104 = arith.constant dense<0.000000e+00> : vector<8x512xf32>
    %255 = tpu.matmul %246, %254, %cst_104 {dimension_numbers = #tpu.dot_dimension_numbers<[1], [0], [0], [1], [0, 0, 1, 1], [], []>} : vector<8x128xf32>, vector<128x512xf32>, vector<8x512xf32> -> vector<8x512xf32>
    %256 = arith.addf %253, %255 : vector<8x512xf32>
    %257 = vector.extract_strided_slice %256 {offsets = [0, 0], sizes = [8, 128], strides = [1, 1]} : vector<8x512xf32> to vector<8x128xf32>
    %cst_105 = arith.constant 5.000000e-01 : f32
    %258 = vector.broadcast %cst_105 : f32 to vector<8x128xf32>
    %259 = arith.mulf %258, %257 : vector<8x128xf32>
    %260 = math.tanh %259 : vector<8x128xf32>
    %cst_106 = arith.constant 1.000000e+00 : f32
    %261 = vector.broadcast %cst_106 : f32 to vector<8x128xf32>
    %262 = arith.addf %260, %261 : vector<8x128xf32>
    %cst_107 = arith.constant 5.000000e-01 : f32
    %263 = vector.broadcast %cst_107 : f32 to vector<8x128xf32>
    %264 = arith.mulf %263, %262 : vector<8x128xf32>
    %265 = vector.extract_strided_slice %256 {offsets = [0, 128], sizes = [8, 128], strides = [1, 1]} : vector<8x512xf32> to vector<8x128xf32>
    %cst_108 = arith.constant 5.000000e-01 : f32
    %266 = vector.broadcast %cst_108 : f32 to vector<8x128xf32>
    %267 = arith.mulf %266, %265 : vector<8x128xf32>
    %268 = math.tanh %267 : vector<8x128xf32>
    %cst_109 = arith.constant 1.000000e+00 : f32
    %269 = vector.broadcast %cst_109 : f32 to vector<8x128xf32>
    %270 = arith.addf %268, %269 : vector<8x128xf32>
    %cst_110 = arith.constant 5.000000e-01 : f32
    %271 = vector.broadcast %cst_110 : f32 to vector<8x128xf32>
    %272 = arith.mulf %271, %270 : vector<8x128xf32>
    %273 = vector.extract_strided_slice %256 {offsets = [0, 256], sizes = [8, 128], strides = [1, 1]} : vector<8x512xf32> to vector<8x128xf32>
    %274 = math.tanh %273 : vector<8x128xf32>
    %275 = vector.extract_strided_slice %256 {offsets = [0, 384], sizes = [8, 128], strides = [1, 1]} : vector<8x512xf32> to vector<8x128xf32>
    %cst_111 = arith.constant 5.000000e-01 : f32
    %276 = vector.broadcast %cst_111 : f32 to vector<8x128xf32>
    %277 = arith.mulf %276, %275 : vector<8x128xf32>
    %278 = math.tanh %277 : vector<8x128xf32>
    %cst_112 = arith.constant 1.000000e+00 : f32
    %279 = vector.broadcast %cst_112 : f32 to vector<8x128xf32>
    %280 = arith.addf %278, %279 : vector<8x128xf32>
    %cst_113 = arith.constant 5.000000e-01 : f32
    %281 = vector.broadcast %cst_113 : f32 to vector<8x128xf32>
    %282 = arith.mulf %281, %280 : vector<8x128xf32>
    %283 = arith.mulf %272, %244 : vector<8x128xf32>
    %284 = arith.mulf %264, %274 : vector<8x128xf32>
    %285 = arith.addf %283, %284 : vector<8x128xf32>
    %286 = math.tanh %285 : vector<8x128xf32>
    %287 = arith.mulf %282, %286 : vector<8x128xf32>
    %288 = arith.index_cast %c6_i32 : i32 to index
    %c0_114 = arith.constant 0 : index
    %c0_115 = arith.constant 0 : index
    %289 = vector.load %arg6[%288, %c0_114, %c0_115] : memref<8x8x128xf32, #tpu.memory_space<vmem>>, vector<1x8x128xf32>
    %290 = vector.shape_cast %289 : vector<1x8x128xf32> to vector<8x128xf32>
    %291 = vector.shape_cast %287 : vector<8x128xf32> to vector<1x8x128xf32>
    tpu.vector_store %arg6[%288, %c0_114, %c0_115], %291 {strides = array<i32>} : memref<8x8x128xf32, #tpu.memory_space<vmem>>, vector<1x8x128xf32>,
    %c7_i32 = arith.constant 7 : i32
    %292 = arith.index_cast %c7_i32 : i32 to index
    %c0_116 = arith.constant 0 : index
    %c0_117 = arith.constant 0 : index
    %293 = vector.load %arg2[%292, %c0_116, %c0_117] : memref<8x8x512xf32, #tpu.memory_space<vmem>>, vector<1x8x512xf32>
    %294 = vector.shape_cast %293 : vector<1x8x512xf32> to vector<8x512xf32>
    %c0_118 = arith.constant 0 : index
    %c0_119 = arith.constant 0 : index
    %295 = vector.load %arg5[%c0_118, %c0_119] : memref<128x512xf32, #tpu.memory_space<vmem>>, vector<128x512xf32>
    %cst_120 = arith.constant dense<0.000000e+00> : vector<8x512xf32>
    %296 = tpu.matmul %287, %295, %cst_120 {dimension_numbers = #tpu.dot_dimension_numbers<[1], [0], [0], [1], [0, 0, 1, 1], [], []>} : vector<8x128xf32>, vector<128x512xf32>, vector<8x512xf32> -> vector<8x512xf32>
    %297 = arith.addf %294, %296 : vector<8x512xf32>
    %298 = vector.extract_strided_slice %297 {offsets = [0, 0], sizes = [8, 128], strides = [1, 1]} : vector<8x512xf32> to vector<8x128xf32>
    %cst_121 = arith.constant 5.000000e-01 : f32
    %299 = vector.broadcast %cst_121 : f32 to vector<8x128xf32>
    %300 = arith.mulf %299, %298 : vector<8x128xf32>
    %301 = math.tanh %300 : vector<8x128xf32>
    %cst_122 = arith.constant 1.000000e+00 : f32
    %302 = vector.broadcast %cst_122 : f32 to vector<8x128xf32>
    %303 = arith.addf %301, %302 : vector<8x128xf32>
    %cst_123 = arith.constant 5.000000e-01 : f32
    %304 = vector.broadcast %cst_123 : f32 to vector<8x128xf32>
    %305 = arith.mulf %304, %303 : vector<8x128xf32>
    %306 = vector.extract_strided_slice %297 {offsets = [0, 128], sizes = [8, 128], strides = [1, 1]} : vector<8x512xf32> to vector<8x128xf32>
    %cst_124 = arith.constant 5.000000e-01 : f32
    %307 = vector.broadcast %cst_124 : f32 to vector<8x128xf32>
    %308 = arith.mulf %307, %306 : vector<8x128xf32>
    %309 = math.tanh %308 : vector<8x128xf32>
    %cst_125 = arith.constant 1.000000e+00 : f32
    %310 = vector.broadcast %cst_125 : f32 to vector<8x128xf32>
    %311 = arith.addf %309, %310 : vector<8x128xf32>
    %cst_126 = arith.constant 5.000000e-01 : f32
    %312 = vector.broadcast %cst_126 : f32 to vector<8x128xf32>
    %313 = arith.mulf %312, %311 : vector<8x128xf32>
    %314 = vector.extract_strided_slice %297 {offsets = [0, 256], sizes = [8, 128], strides = [1, 1]} : vector<8x512xf32> to vector<8x128xf32>
    %315 = math.tanh %314 : vector<8x128xf32>
    %316 = vector.extract_strided_slice %297 {offsets = [0, 384], sizes = [8, 128], strides = [1, 1]} : vector<8x512xf32> to vector<8x128xf32>
    %cst_127 = arith.constant 5.000000e-01 : f32
    %317 = vector.broadcast %cst_127 : f32 to vector<8x128xf32>
    %318 = arith.mulf %317, %316 : vector<8x128xf32>
    %319 = math.tanh %318 : vector<8x128xf32>
    %cst_128 = arith.constant 1.000000e+00 : f32
    %320 = vector.broadcast %cst_128 : f32 to vector<8x128xf32>
    %321 = arith.addf %319, %320 : vector<8x128xf32>
    %cst_129 = arith.constant 5.000000e-01 : f32
    %322 = vector.broadcast %cst_129 : f32 to vector<8x128xf32>
    %323 = arith.mulf %322, %321 : vector<8x128xf32>
    %324 = arith.mulf %313, %285 : vector<8x128xf32>
    %325 = arith.mulf %305, %315 : vector<8x128xf32>
    %326 = arith.addf %324, %325 : vector<8x128xf32>
    %327 = math.tanh %326 : vector<8x128xf32>
    %328 = arith.mulf %323, %327 : vector<8x128xf32>
    %329 = arith.index_cast %c7_i32 : i32 to index
    %c0_130 = arith.constant 0 : index
    %c0_131 = arith.constant 0 : index
    %330 = vector.load %arg6[%329, %c0_130, %c0_131] : memref<8x8x128xf32, #tpu.memory_space<vmem>>, vector<1x8x128xf32>
    %331 = vector.shape_cast %330 : vector<1x8x128xf32> to vector<8x128xf32>
    %332 = vector.shape_cast %328 : vector<8x128xf32> to vector<1x8x128xf32>
    tpu.vector_store %arg6[%329, %c0_130, %c0_131], %332 {strides = array<i32>} : memref<8x8x128xf32, #tpu.memory_space<vmem>>, vector<1x8x128xf32>,
    %c8_i32 = arith.constant 8 : i32
    %c0_132 = arith.constant 0 : index
    %c0_133 = arith.constant 0 : index
    %333 = vector.load %arg7[%c0_132, %c0_133] : memref<8x128xf32, #tpu.memory_space<vmem>>, vector<8x128xf32>
    tpu.vector_store %arg7[%c0_132, %c0_133], %328 {strides = array<i32>} : memref<8x128xf32, #tpu.memory_space<vmem>>, vector<8x128xf32>,
    %c0_134 = arith.constant 0 : index
    %c0_135 = arith.constant 0 : index
    %334 = vector.load %arg8[%c0_134, %c0_135] : memref<8x128xf32, #tpu.memory_space<vmem>>, vector<8x128xf32>
    tpu.vector_store %arg8[%c0_134, %c0_135], %326 {strides = array<i32>} : memref<8x128xf32, #tpu.memory_space<vmem>>, vector<8x128xf32>,
    return
  }
  func.func @transform_0(%arg0: i32, %arg1: i32) -> (i32, i32, i32) {
    %c0_i32 = arith.constant 0 : i32
    %c0_i32_0 = arith.constant 0 : i32
    return %arg1, %arg0, %c0_i32 : i32, i32, i32
  }
  func.func @transform_1(%arg0: i32, %arg1: i32) -> (i32, i32) {
    %c0_i32 = arith.constant 0 : i32
    %c0_i32_0 = arith.constant 0 : i32
    return %arg0, %c0_i32 : i32, i32
  }
  func.func @transform_2(%arg0: i32, %arg1: i32) -> (i32, i32) {
    %c0_i32 = arith.constant 0 : i32
    %c0_i32_0 = arith.constant 0 : i32
    return %arg0, %c0_i32 : i32, i32
  }
  func.func @transform_3(%arg0: i32, %arg1: i32) -> (i32, i32) {
    %c0_i32 = arith.constant 0 : i32
    %c0_i32_0 = arith.constant 0 : i32
    %c0_i32_1 = arith.constant 0 : i32
    return %c0_i32, %c0_i32_0 : i32, i32
  }
  func.func @transform_4(%arg0: i32, %arg1: i32) -> (i32, i32, i32) {
    %c0_i32 = arith.constant 0 : i32
    %c0_i32_0 = arith.constant 0 : i32
    return %arg1, %arg0, %c0_i32 : i32, i32, i32
  }
  func.func @transform_5(%arg0: i32, %arg1: i32) -> (i32, i32) {
    %c0_i32 = arith.constant 0 : i32
    %c0_i32_0 = arith.constant 0 : i32
    return %arg0, %c0_i32 : i32, i32
  }
  func.func @transform_6(%arg0: i32, %arg1: i32) -> (i32, i32) {
    %c0_i32 = arith.constant 0 : i32
    %c0_i32_0 = arith.constant 0 : i32
    return %arg0, %c0_i32 : i32, i32
  }
}

</mosaic_0001>

<bundles_post_ra>
// kernel: tpu_custom_call.1
= control target key start
LH: loop header
LB: loop body
LE: loop exit
PB: predicated region body
PF: predicated region fallthrough
CT: control target
= control target key end

     0   :  { %12 = vsyncpa [#allocation3], 0  ;;  %s2647_s0 = inlined_call_operand.hbm [shape: f32[8,8,512], index: 0, kind: input, shape index: {}]   ;;  %s2648_s1 = inlined_call_operand.hbm [shape: f32[8,128], index: 1, kind: input, shape index: {}]   ;;  %s2649_s2 = inlined_call_operand.hbm [shape: f32[8,128], index: 2, kind: input, shape index: {}]   ;;  %s2650_s3 = inlined_call_operand.hbm [shape: f32[128,512], index: 3, kind: input, shape index: {}]   ;;  %s2651_s4 = inlined_call_operand.hbm [shape: f32[8,8,128], index: 4, kind: output, shape index: {0}]   ;;  %s2652_s5 = inlined_call_operand.hbm [shape: f32[8,128], index: 5, kind: output, shape index: {1}]   ;;  %s2653_s6 = inlined_call_operand.hbm [shape: f32[8,128], index: 6, kind: output, shape index: {2}]  }
   0x1   :  { %13 = vsyncpa [#allocation6], 0 }
   0x2   :  { %14 = vsyncpa [#allocation9], 0 }
   0x3   :  { %15 = vsyncpa [#allocation4], 0  ;;  %s35_s23 = sshll.u32 %s2648_s1, 4  ;;  %s36_s23 = int_to_ptr.hbm [resolvable:$true] %s35_s23 }
   0x4   :  { %16 = vsyncpa [#allocation12], 0  ;;  %s1796_s24 = smov [#allocation5]   ;;  %s21_s28 = sshll.u32 %s2647_s0, 4  ;;  %s22_s28 = int_to_ptr.hbm [resolvable:$true] %s21_s28 }
   0x5   :  { %s37_s25 = sshll.u32 %s1796_s24, 4  ;;  %s1797_s29 = smov [#allocation2]   ;;  %s38_s25 = int_to_ptr.vmem [resolvable:$true] %s37_s25 }
   0x6   :  { %40 = dma.hbm_to_vmem [thread:$0]  %s36_s23, 128, %s38_s25, [#allocation6]  }
   0x7   :  { %s23_s30 = sshll.u32 %s1797_s29, 4  ;;  %s1798_s7 = smov 512   ;;  %s24_s30 = int_to_ptr.vmem [resolvable:$true] %s23_s30 }
   0x8   :  { %s1799_s8 = smov 32   ;;  %s46_s1 = sshll.u32 %s2649_s2, 4  ;;  %s47_s1 = int_to_ptr.hbm [resolvable:$true] %s46_s1 }
   0x9   :  { %29 = dma.hbm_to_vmem [thread:$0]  %s22_s28, 4096, %s24_s30, [#allocation3], %s1798_s7, %s1798_s7, %s1799_s8  }
   0xa   :  { %s1800_s11 = smov [#allocation7]   ;;  %s56_s0 = sshll.u32 %s2650_s3, 4  ;;  %s57_s0 = int_to_ptr.hbm [resolvable:$true] %s56_s0 }
   0xb   :  { %s48_s12 = sshll.u32 %s1800_s11, 4  ;;  %s1801_s15 = smov [#allocation8]   ;;  %s49_s12 = int_to_ptr.vmem [resolvable:$true] %s48_s12 }
   0xc   :  { %51 = dma.hbm_to_vmem [thread:$0]  %s47_s1, 128, %s49_s12, [#allocation6]  }
   0xd   :  { %s58_s16 = sshll.u32 %s1801_s15, 4  ;;  %s59_s16 = int_to_ptr.vmem [resolvable:$true] %s58_s16 }
   0xe   :  { %64 = dma.hbm_to_vmem [thread:$0]  %s57_s0, 8192, %s59_s16, [#allocation9], %s1798_s7, %s1798_s7, %s1799_s8  }
   0xf   :  { %1786 = dma.done.wait [#allocation3], 4096  }
  0x10   :  { %1787 = vsyncadd [#allocation3], 4294963200 }
  0x11   :  { %1788 = dma.done.wait [#allocation6], 256  }
  0x12   :  { %1789 = vsyncadd [#allocation6], 4294967040 }
  0x13   :  { %1790 = dma.done.wait [#allocation9], 8192  }
  0x14   :  { %1791 = vsyncadd [#allocation9], 4294959104  ;;  %v1854_v0 = vld [vmem:[#allocation8 + $0x1e0] sm:$0xff]  ;;  %v1856_v1 = vld [vmem:[#allocation8 + $0x1e8] sm:$0xff]  ;;  %s1802_s2 = smov [#allocation10]   ;;  %s1481_s19 = sshll.u32 %s2651_s4, 4  ;;  %s1482_s19 = int_to_ptr.hbm [resolvable:$true] %s1481_s19 }
  0x15   :  { %v1858_v2 = vld [vmem:[#allocation8 + $0x1f0] sm:$0xff]  ;;  %159 = vmatpush.msra.mxu0 %v1854_v0  ;;  %179 = vmatpush.msra.mxu1 %v1856_v1  ;;  %v1862_v3 = vld [vmem:[#allocation8 + $0x1c0] sm:$0xff]  ;;  %v1864_v4 = vld [vmem:[#allocation8 + $0x1c8] sm:$0xff]  ;;  %s1479_s3 = sshll.u32 %s1802_s2, 4  ;;  %s1803_s20 = smov [#allocation11]   ;;  %s1480_s3 = int_to_ptr.vmem [resolvable:$true] %s1479_s3 }
  0x16   :  { %v1866_v5 = vld [vmem:[#allocation8 + $0x1d0] sm:$0xff]  ;;  %199 = vmatpush.msra.mxu2 %v1858_v2  ;;  %v1869_v6 = vld [vmem:[#allocation8 + $0x1a0] sm:$0xff]  ;;  %v1871_v7 = vld [vmem:[#allocation8 + $0x1a8] sm:$0xff]  ;;  %s1493_s21 = sshll.u32 %s1803_s20, 4  ;;  %s1495_s24 = sshll.u32 %s2652_s5, 4  ;;  %s1494_s21 = int_to_ptr.vmem [resolvable:$true] %s1493_s21  ;;  %s1496_s24 = int_to_ptr.hbm [resolvable:$true] %s1495_s24 }
  0x17   :  { %160 = vmatpush.msra.mxu0 %v1862_v3  ;;  %180 = vmatpush.msra.mxu1 %v1864_v4  ;;  %v1875_v8 = vld [vmem:[#allocation8 + $0x1b0] sm:$0xff]  ;;  %v1877_v9 = vld [vmem:[#allocation8 + $0x1f8] sm:$0xff]  ;;  %v1881_v10 = vld [vmem:[#allocation8 + $0x180] sm:$0xff]  ;;  %s1804_s25 = smov [#allocation13]   ;;  %s1506_s29 = sshll.u32 %s2653_s6, 4  ;;  %s1507_s29 = int_to_ptr.hbm [resolvable:$true] %s1506_s29 }
  0x18   :  { %200 = vmatpush.msra.mxu2 %v1866_v5  ;;  %219 = vmatpush.msra.mxu3 %v1877_v9  ;;  %v1883_v11 = vld [vmem:[#allocation8 + $0x188] sm:$0xff]  ;;  %v1885_v12 = vld [vmem:[#allocation8 + $0x1d8] sm:$0xff]  ;;  %v1889_v13 = vld [vmem:[#allocation8 + $0x190] sm:$0xff]  ;;  %s1504_s26 = sshll.u32 %s1804_s25, 4  ;;  %s1805_s4 = smov 128   ;;  %s1505_s26 = int_to_ptr.vmem [resolvable:$true] %s1504_s26 }
  0x19   :  { %161 = vmatpush.msra.mxu0 %v1869_v6  ;;  %181 = vmatpush.msra.mxu1 %v1871_v7  ;;  %v1891_v14 = vld [vmem:[#allocation8 + $0x1b8] sm:$0xff]  ;;  %v1895_v15 = vld [vmem:[#allocation8 + $0x160] sm:$0xff]  ;;  %v1897_v16 = vld [vmem:[#allocation8 + $0x168] sm:$0xff]  ;;  %s1806_s30 = smov 8  }
  0x1a   :  { %201 = vmatpush.msra.mxu2 %v1875_v8  ;;  %220 = vmatpush.msra.mxu3 %v1885_v12  ;;  %v1901_v17 = vld [vmem:[#allocation8 + $0x170] sm:$0xff]  ;;  %v1903_v18 = vld [vmem:[#allocation8 + $0x198] sm:$0xff]  ;;  %v1907_v19 = vld [vmem:[#allocation8 + $0x140] sm:$0xff] }
  0x1b   :  { %162 = vmatpush.msra.mxu0 %v1881_v10  ;;  %182 = vmatpush.msra.mxu1 %v1883_v11  ;;  %v1909_v20 = vld [vmem:[#allocation8 + $0x148] sm:$0xff]  ;;  %v1913_v21 = vld [vmem:[#allocation8 + $0x150] sm:$0xff]  ;;  %v1915_v22 = vld [vmem:[#allocation8 + $0x178] sm:$0xff] }
  0x1c   :  { %202 = vmatpush.msra.mxu2 %v1889_v13  ;;  %221 = vmatpush.msra.mxu3 %v1891_v14  ;;  %v1919_v23 = vld [vmem:[#allocation8 + $0x120] sm:$0xff]  ;;  %v1921_v24 = vld [vmem:[#allocation8 + $0x128] sm:$0xff]  ;;  %v1925_v25 = vld [vmem:[#allocation8 + $0x130] sm:$0xff] }
  0x1d   :  { %163 = vmatpush.msra.mxu0 %v1895_v15  ;;  %183 = vmatpush.msra.mxu1 %v1897_v16  ;;  %v1927_v26 = vld [vmem:[#allocation8 + $0x158] sm:$0xff]  ;;  %v1931_v27 = vld [vmem:[#allocation8 + $0x100] sm:$0xff]  ;;  %v1933_v28 = vld [vmem:[#allocation8 + $0x108] sm:$0xff] }
  0x1e   :  { %203 = vmatpush.msra.mxu2 %v1901_v17  ;;  %222 = vmatpush.msra.mxu3 %v1903_v18  ;;  %v1937_v29 = vld [vmem:[#allocation8 + $0x110] sm:$0xff]  ;;  %v1939_v30 = vld [vmem:[#allocation8 + $0x138] sm:$0xff]  ;;  %v1943_v31 = vld [vmem:[#allocation8 + $0xe0] sm:$0xff] }
  0x1f   :  { %164 = vmatpush.msra.mxu0 %v1907_v19  ;;  %184 = vmatpush.msra.mxu1 %v1909_v20  ;;  %v1945_v32 = vld [vmem:[#allocation8 + $0xe8] sm:$0xff]  ;;  %v1949_v33 = vld [vmem:[#allocation8 + $0xf0] sm:$0xff]  ;;  %v1951_v34 = vld [vmem:[#allocation8 + $0x118] sm:$0xff] }
  0x20   :  { %204 = vmatpush.msra.mxu2 %v1913_v21  ;;  %223 = vmatpush.msra.mxu3 %v1915_v22  ;;  %v1955_v35 = vld [vmem:[#allocation8 + $0xc0] sm:$0xff]  ;;  %v1957_v36 = vld [vmem:[#allocation8 + $0xc8] sm:$0xff]  ;;  %v1961_v37 = vld [vmem:[#allocation8 + $0xd0] sm:$0xff] }
  0x21   :  { %165 = vmatpush.msra.mxu0 %v1919_v23  ;;  %185 = vmatpush.msra.mxu1 %v1921_v24  ;;  %v1963_v38 = vld [vmem:[#allocation8 + $0xf8] sm:$0xff]  ;;  %v1967_v39 = vld [vmem:[#allocation8 + $0xa0] sm:$0xff]  ;;  %v1969_v40 = vld [vmem:[#allocation8 + $0xa8] sm:$0xff] }
  0x22   :  { %205 = vmatpush.msra.mxu2 %v1925_v25  ;;  %224 = vmatpush.msra.mxu3 %v1927_v26  ;;  %v1973_v41 = vld [vmem:[#allocation8 + $0xb0] sm:$0xff]  ;;  %v1975_v42 = vld [vmem:[#allocation8 + $0xd8] sm:$0xff]  ;;  %v1979_v43 = vld [vmem:[#allocation8 + $0x80] sm:$0xff] }
  0x23   :  { %166 = vmatpush.msra.mxu0 %v1931_v27  ;;  %186 = vmatpush.msra.mxu1 %v1933_v28  ;;  %2716 = vst [vmem:[#allocation19_spill] sm:$0xff] %v1979_v43  ;;  %v1981_v44 = vld [vmem:[#allocation8 + $0x88] sm:$0xff]  ;;  %v1985_v45 = vld [vmem:[#allocation8 + $0x90] sm:$0xff]  ;;  %v1987_v46 = vld [vmem:[#allocation8 + $0xb8] sm:$0xff] }
  0x24   :  { %206 = vmatpush.msra.mxu2 %v1937_v29  ;;  %225 = vmatpush.msra.mxu3 %v1939_v30  ;;  %2717 = vst [vmem:[#allocation20_spill] sm:$0xff] %v1981_v44  ;;  %v1991_v47 = vld [vmem:[#allocation8 + $0x60] sm:$0xff]  ;;  %v1993_v48 = vld [vmem:[#allocation8 + $0x68] sm:$0xff]  ;;  %v1997_v49 = vld [vmem:[#allocation8 + $0x70] sm:$0xff] }
  0x25   :  { %167 = vmatpush.msra.mxu0 %v1943_v31  ;;  %187 = vmatpush.msra.mxu1 %v1945_v32  ;;  %2718 = vst [vmem:[#allocation21_spill] sm:$0xff] %v1985_v45  ;;  %v1999_v50 = vld [vmem:[#allocation8 + $0x98] sm:$0xff]  ;;  %v2003_v51 = vld [vmem:[#allocation8 + $0x40] sm:$0xff]  ;;  %v2005_v52 = vld [vmem:[#allocation8 + $0x48] sm:$0xff] }
  0x26   :  { %207 = vmatpush.msra.mxu2 %v1949_v33  ;;  %226 = vmatpush.msra.mxu3 %v1951_v34  ;;  %2719 = vst [vmem:[#allocation22_spill] sm:$0xff] %v1991_v47  ;;  %v2009_v53 = vld [vmem:[#allocation8 + $0x50] sm:$0xff]  ;;  %v2011_v54 = vld [vmem:[#allocation8 + $0x78] sm:$0xff]  ;;  %v2015_v55 = vld [vmem:[#allocation8 + $0x20] sm:$0xff] }
  0x27   :  { %168 = vmatpush.msra.mxu0 %v1955_v35  ;;  %188 = vmatpush.msra.mxu1 %v1957_v36  ;;  %2720 = vst [vmem:[#allocation23_spill] sm:$0xff] %v1993_v48  ;;  %v2017_v56 = vld [vmem:[#allocation8 + $0x28] sm:$0xff]  ;;  %v2021_v57 = vld [vmem:[#allocation8 + $0x30] sm:$0xff]  ;;  %v2023_v58 = vld [vmem:[#allocation8 + $0x58] sm:$0xff] }
  0x28   :  { %208 = vmatpush.msra.mxu2 %v1961_v37  ;;  %227 = vmatpush.msra.mxu3 %v1963_v38  ;;  %2721 = vst [vmem:[#allocation24_spill] sm:$0xff] %v1997_v49  ;;  %v2027_v59 = vld [vmem:[#allocation8] sm:$0xff]  ;;  %v2029_v60 = vld [vmem:[#allocation8 + $0x8] sm:$0xff]  ;;  %v2033_v61 = vld [vmem:[#allocation8 + $0x10] sm:$0xff] }
  0x29   :  { %169 = vmatpush.msra.mxu0 %v1967_v39  ;;  %189 = vmatpush.msra.mxu1 %v1969_v40  ;;  %2722 = vst [vmem:[#allocation25_spill] sm:$0xff] %v1999_v50  ;;  %v85_v62 = vld [vmem:[#allocation5] sm:$0xff]  ;;  %v2039_v63 = vld [vmem:[#allocation8 + $0x38] sm:$0xff] }
  0x2a   :  { %209 = vmatpush.msra.mxu2 %v1973_v41  ;;  %228 = vmatpush.msra.mxu3 %v1975_v42  ;;  %2723 = vst [vmem:[#allocation26_spill] sm:$0xff] %v2003_v51 }
  0x2b   :  { %170 = vmatpush.msra.mxu0 %v1979_v43  ;;  %190 = vmatpush.msra.mxu1 %v1981_v44  ;;  %2724 = vst [vmem:[#allocation27_spill] sm:$0xff] %v2005_v52 }
  0x2c   :  { %210 = vmatpush.msra.mxu2 %v1985_v45  ;;  %229 = vmatpush.msra.mxu3 %v1987_v46  ;;  %2725 = vst [vmem:[#allocation28_spill] sm:$0xff] %v2009_v53 }
  0x2d   :  { %171 = vmatpush.msra.mxu0 %v1991_v47  ;;  %191 = vmatpush.msra.mxu1 %v1993_v48  ;;  %2726 = vst [vmem:[#allocation29_spill] sm:$0xff] %v2011_v54 }
  0x2e   :  { %211 = vmatpush.msra.mxu2 %v1997_v49  ;;  %230 = vmatpush.msra.mxu3 %v1999_v50  ;;  %2727 = vst [vmem:[#allocation30_spill] sm:$0xff] %v2015_v55 }
  0x2f   :  { %2728 = vst [vmem:[#allocation31_spill] sm:$0xff] %v2017_v56  ;;  %172 = vmatpush.msra.mxu0 %v2003_v51  ;;  %192 = vmatpush.msra.mxu1 %v2005_v52 }
  0x30   :  { %2729 = vst [vmem:[#allocation32_spill] sm:$0xff] %v2021_v57  ;;  %212 = vmatpush.msra.mxu2 %v2009_v53  ;;  %231 = vmatpush.msra.mxu3 %v2011_v54 }
  0x31   :  { %2730 = vst [vmem:[#allocation33_spill] sm:$0xff] %v2023_v58  ;;  %173 = vmatpush.msra.mxu0 %v2015_v55  ;;  %193 = vmatpush.msra.mxu1 %v2017_v56  ;;  %v2042_v55 = vld [vmem:[#allocation8 + $0x18] sm:$0xff] }
  0x32   :  { %2731 = vst [vmem:[#allocation34_spill] sm:$0xff] %v2027_v59  ;;  %213 = vmatpush.msra.mxu2 %v2021_v57  ;;  %232 = vmatpush.msra.mxu3 %v2023_v58 }
  0x33   :  { %2732 = vst [vmem:[#allocation35_spill] sm:$0xff] %v2029_v60  ;;  %174 = vmatpush.msra.mxu0 %v2027_v59  ;;  %194 = vmatpush.msra.mxu1 %v2029_v60 }
  0x34   :  { %2733 = vst [vmem:[#allocation36_spill] sm:$0xff] %v2033_v61  ;;  %214 = vmatpush.msra.mxu2 %v2033_v61  ;;  %175 = vmatmul.f32.vlgmr.msra.gmra.mxu0 %v85_v62 }
  0x35   :  { %2734 = vst [vmem:[#allocation37_spill] sm:$0xff] %v2039_v63  ;;  %195 = vmatmul.f32.vlgmr.msra.gmra.mxu1 %v85_v62  ;;  %215 = vmatmul.f32.vlgmr.msra.gmra.mxu2 %v85_v62 }
  0x36   :  { %2735 = vst [vmem:[#allocation38_spill] sm:$0xff] %v2042_v55  ;;  %233 = vmatpush.msra.mxu3 %v2039_v63  ;;  %331 = vmatpush.msrb.mxu0 %v1854_v0 }
  0x37   :  { %351 = vmatpush.msrb.mxu1 %v1856_v1  ;;  %371 = vmatpush.msrb.mxu2 %v1858_v2 }
  0x38   :  { %234 = vmatpush.msra.mxu3 %v2042_v55  ;;  %332 = vmatpush.msrb.mxu0 %v1862_v3 }
  0x39   :  { %235 = vmatmul.f32.vlgmr.msra.gmra.mxu3 %v85_v62  ;;  %352 = vmatpush.msrb.mxu1 %v1864_v4  ;;  %v2736_v62 = vld [vmem:[#allocation30_spill] sm:$0xff] }
  0x3a   :  { %391 = vmatpush.msrb.mxu3 %v1877_v9  ;;  %372 = vmatpush.msrb.mxu2 %v1866_v5 }
  0x3b   :  { %333 = vmatpush.msrb.mxu0 %v1869_v6  ;;  %353 = vmatpush.msrb.mxu1 %v1871_v7 }
  0x3c   :  { %392 = vmatpush.msrb.mxu3 %v1885_v12  ;;  %373 = vmatpush.msrb.mxu2 %v1875_v8 }
  0x3d   :  { %334 = vmatpush.msrb.mxu0 %v1881_v10  ;;  %354 = vmatpush.msrb.mxu1 %v1883_v11 }
  0x3e   :  { %393 = vmatpush.msrb.mxu3 %v1891_v14  ;;  %374 = vmatpush.msrb.mxu2 %v1889_v13 }
  0x3f   :  { %335 = vmatpush.msrb.mxu0 %v1895_v15  ;;  %355 = vmatpush.msrb.mxu1 %v1897_v16 }
  0x40   :  { %394 = vmatpush.msrb.mxu3 %v1903_v18  ;;  %375 = vmatpush.msrb.mxu2 %v1901_v17 }
  0x41   :  { %336 = vmatpush.msrb.mxu0 %v1907_v19  ;;  %356 = vmatpush.msrb.mxu1 %v1909_v20 }
  0x42   :  { %395 = vmatpush.msrb.mxu3 %v1915_v22  ;;  %376 = vmatpush.msrb.mxu2 %v1913_v21 }
  0x43   :  { %337 = vmatpush.msrb.mxu0 %v1919_v23  ;;  %357 = vmatpush.msrb.mxu1 %v1921_v24 }
  0x44   :  { %396 = vmatpush.msrb.mxu3 %v1927_v26  ;;  %377 = vmatpush.msrb.mxu2 %v1925_v25 }
  0x45   :  { %338 = vmatpush.msrb.mxu0 %v1931_v27  ;;  %358 = vmatpush.msrb.mxu1 %v1933_v28 }
  0x46   :  { %397 = vmatpush.msrb.mxu3 %v1939_v30  ;;  %378 = vmatpush.msrb.mxu2 %v1937_v29 }
  0x47   :  { %339 = vmatpush.msrb.mxu0 %v1943_v31  ;;  %359 = vmatpush.msrb.mxu1 %v1945_v32 }
  0x48   :  { %398 = vmatpush.msrb.mxu3 %v1951_v34  ;;  %379 = vmatpush.msrb.mxu2 %v1949_v33 }
  0x49   :  { %340 = vmatpush.msrb.mxu0 %v1955_v35  ;;  %360 = vmatpush.msrb.mxu1 %v1957_v36 }
  0x4a   :  { %399 = vmatpush.msrb.mxu3 %v1963_v38  ;;  %380 = vmatpush.msrb.mxu2 %v1961_v37 }
  0x4b   :  { %341 = vmatpush.msrb.mxu0 %v1967_v39  ;;  %361 = vmatpush.msrb.mxu1 %v1969_v40 }
  0x4c   :  { %400 = vmatpush.msrb.mxu3 %v1975_v42  ;;  %381 = vmatpush.msrb.mxu2 %v1973_v41 }
  0x4d   :  { %342 = vmatpush.msrb.mxu0 %v1979_v43  ;;  %362 = vmatpush.msrb.mxu1 %v1981_v44 }
  0x4e   :  { %401 = vmatpush.msrb.mxu3 %v1987_v46  ;;  %382 = vmatpush.msrb.mxu2 %v1985_v45 }
  0x4f   :  { %343 = vmatpush.msrb.mxu0 %v1991_v47  ;;  %363 = vmatpush.msrb.mxu1 %v1993_v48 }
  0x50   :  { %402 = vmatpush.msrb.mxu3 %v1999_v50  ;;  %383 = vmatpush.msrb.mxu2 %v1997_v49 }
  0x51   :  { %344 = vmatpush.msrb.mxu0 %v2003_v51  ;;  %364 = vmatpush.msrb.mxu1 %v2005_v52 }
  0x52   :  { %403 = vmatpush.msrb.mxu3 %v2011_v54  ;;  %384 = vmatpush.msrb.mxu2 %v2009_v53 }
  0x53   :  { %345 = vmatpush.msrb.mxu0 %v2736_v62  ;;  %365 = vmatpush.msrb.mxu1 %v2017_v56 }
  0x54   :  { %404 = vmatpush.msrb.mxu3 %v2023_v58  ;;  %385 = vmatpush.msrb.mxu2 %v2021_v57 }
  0x55   :  { %346 = vmatpush.msrb.mxu0 %v2027_v59  ;;  %366 = vmatpush.msrb.mxu1 %v2029_v60 }
  0x56   :  { %405 = vmatpush.msrb.mxu3 %v2039_v63  ;;  %386 = vmatpush.msrb.mxu2 %v2033_v61 }
  0x57   :  { %504 = vmatpush.msra.mxu0 %v1854_v0  ;;  %524 = vmatpush.msra.mxu1 %v1856_v1 }
  0x58   :  { %406 = vmatpush.msrb.mxu3 %v2042_v55  ;;  %544 = vmatpush.msra.mxu2 %v1858_v2 }
  0x59   :  { %505 = vmatpush.msra.mxu0 %v1862_v3  ;;  %525 = vmatpush.msra.mxu1 %v1864_v4 }
  0x5a   :  { %564 = vmatpush.msra.mxu3 %v1877_v9  ;;  %545 = vmatpush.msra.mxu2 %v1866_v5 }
  0x5b   :  { %506 = vmatpush.msra.mxu0 %v1869_v6  ;;  %526 = vmatpush.msra.mxu1 %v1871_v7 }
  0x5c   :  { %565 = vmatpush.msra.mxu3 %v1885_v12  ;;  %546 = vmatpush.msra.mxu2 %v1875_v8 }
  0x5d   :  { %507 = vmatpush.msra.mxu0 %v1881_v10  ;;  %527 = vmatpush.msra.mxu1 %v1883_v11 }
  0x5e   :  { %566 = vmatpush.msra.mxu3 %v1891_v14  ;;  %547 = vmatpush.msra.mxu2 %v1889_v13 }
  0x5f   :  { %508 = vmatpush.msra.mxu0 %v1895_v15  ;;  %528 = vmatpush.msra.mxu1 %v1897_v16 }
  0x60   :  { %567 = vmatpush.msra.mxu3 %v1903_v18  ;;  %548 = vmatpush.msra.mxu2 %v1901_v17 }
  0x61   :  { %509 = vmatpush.msra.mxu0 %v1907_v19  ;;  %529 = vmatpush.msra.mxu1 %v1909_v20 }
  0x62   :  { %568 = vmatpush.msra.mxu3 %v1915_v22  ;;  %549 = vmatpush.msra.mxu2 %v1913_v21 }
  0x63   :  { %510 = vmatpush.msra.mxu0 %v1919_v23  ;;  %530 = vmatpush.msra.mxu1 %v1921_v24 }
  0x64   :  { %569 = vmatpush.msra.mxu3 %v1927_v26  ;;  %550 = vmatpush.msra.mxu2 %v1925_v25 }
  0x65   :  { %511 = vmatpush.msra.mxu0 %v1931_v27  ;;  %531 = vmatpush.msra.mxu1 %v1933_v28 }
  0x66   :  { %570 = vmatpush.msra.mxu3 %v1939_v30  ;;  %551 = vmatpush.msra.mxu2 %v1937_v29 }
  0x67   :  { %512 = vmatpush.msra.mxu0 %v1943_v31  ;;  %532 = vmatpush.msra.mxu1 %v1945_v32 }
  0x68   :  { %571 = vmatpush.msra.mxu3 %v1951_v34  ;;  %552 = vmatpush.msra.mxu2 %v1949_v33 }
  0x69   :  { %513 = vmatpush.msra.mxu0 %v1955_v35  ;;  %533 = vmatpush.msra.mxu1 %v1957_v36 }
  0x6a   :  { %572 = vmatpush.msra.mxu3 %v1963_v38  ;;  %553 = vmatpush.msra.mxu2 %v1961_v37 }
  0x6b   :  { %514 = vmatpush.msra.mxu0 %v1967_v39  ;;  %534 = vmatpush.msra.mxu1 %v1969_v40 }
  0x6c   :  { %573 = vmatpush.msra.mxu3 %v1975_v42  ;;  %554 = vmatpush.msra.mxu2 %v1973_v41 }
  0x6d   :  { %515 = vmatpush.msra.mxu0 %v1979_v43  ;;  %535 = vmatpush.msra.mxu1 %v1981_v44  ;;  %v87_v43 = vld [vmem:[#allocation7] sm:$0xff] }
  0x6e   :  { %574 = vmatpush.msra.mxu3 %v1987_v46  ;;  %555 = vmatpush.msra.mxu2 %v1985_v45 }
  0x6f   :  { %516 = vmatpush.msra.mxu0 %v1991_v47  ;;  %536 = vmatpush.msra.mxu1 %v1993_v48 }
  0x70   :  { %575 = vmatpush.msra.mxu3 %v1999_v50  ;;  %556 = vmatpush.msra.mxu2 %v1997_v49 }
  0x71   :  { %517 = vmatpush.msra.mxu0 %v2003_v51  ;;  %537 = vmatpush.msra.mxu1 %v2005_v52  ;;  %v91_v52 = vld [vmem:[#allocation2] sm:$0xff] }
  0x72   :  { %576 = vmatpush.msra.mxu3 %v2011_v54  ;;  %557 = vmatpush.msra.mxu2 %v2009_v53  ;;  %v92_v53 = vld [vmem:[#allocation2 + $0x8] sm:$0xff] }
  0x73   :  { %518 = vmatpush.msra.mxu0 %v2736_v62  ;;  %538 = vmatpush.msra.mxu1 %v2017_v56 }
  0x74   :  { %577 = vmatpush.msra.mxu3 %v2023_v58  ;;  %558 = vmatpush.msra.mxu2 %v2021_v57  ;;  %v93_v57 = vld [vmem:[#allocation2 + $0x10] sm:$0xff] }
  0x75   :  { %519 = vmatpush.msra.mxu0 %v2027_v59  ;;  %539 = vmatpush.msra.mxu1 %v2029_v60  ;;  %v94_v59 = vld [vmem:[#allocation2 + $0x18] sm:$0xff] }
  0x76   :  { %578 = vmatpush.msra.mxu3 %v2039_v63  ;;  %559 = vmatpush.msra.mxu2 %v2033_v61 }
  0x78   :  { %579 = vmatpush.msra.mxu3 %v2042_v55 }
  0xb1   :  { %v176_v51 = vpop.f32.mrf.mxu0 }
  0xb2   :  { %v239_v58 = vadd.f32 %v176_v51, %v91_v52  ;;  %v196_v54 = vpop.f32.mrf.mxu1 }
  0xb3   :  { %v240_v62 = vadd.f32 %v196_v54, %v92_v53 }
  0xb4   :  { %v243_v49 = vmul.f32 0.5, %v239_v58 }
  0xb5   :  { %v247_v56 = vmul.f32 0.5, %v240_v62 }
  0xb6   :  { %1538 = vtanh.f32 %v243_v49 }
  0xb7   :  { %1540 = vtanh.f32 %v247_v56 }
  0xb8   :  { %v216_v63 = vpop.f32.mrf.mxu2 }
  0xb9   :  { %v241_v48 = vadd.f32 %v216_v63, %v93_v57 }
  0xbb   :  { %1542 = vtanh.f32 %v241_v48 }
  0xbc   :  { %v1539_v60 = vpop.eup %1538  ;;  %v236_v47 = vpop.f32.mrf.mxu3 }
  0xbd   :  { %v1541_v61 = vpop.eup %1540  ;;  %v245_v50 = vadd.f32 1.0, %v1539_v60  ;;  %v242_v55 = vadd.f32 %v236_v47, %v94_v59  ;;  %v436_v59 = vld [vmem:[#allocation2 + $0x40] sm:$0xff]  ;;  %v437_v60 = vld [vmem:[#allocation2 + $0x48] sm:$0xff] }
  0xbe   :  { %v249_v45 = vadd.f32 1.0, %v1541_v61  ;;  %v2242_v61 = vld [vmem:[#allocation8 + $0x1e0] sm:$0xff] }
  0xbf   :  { %v246_v44 = vmul.f32 0.5, %v245_v50  ;;  %v252_v51 = vmul.f32 0.5, %v242_v55 }
  0xc0   :  { %v250_v52 = vmul.f32 0.5, %v249_v45 }
  0xc1   :  { %v1543_v53 = vpop.eup %1542  ;;  %1544 = vtanh.f32 %v252_v51  ;;  %v2244_v51 = vld [vmem:[#allocation8 + $0x1e8] sm:$0xff] }
  0xc2   :  { %v256_v54 = vmul.f32 %v250_v52, %v87_v43  ;;  %v257_v49 = vmul.f32 %v1543_v53, %v246_v44  ;;  %v2246_v52 = vld [vmem:[#allocation8 + $0x1f0] sm:$0xff] }
  0xc4   :  { %v2174_v58 = vadd.f32 %v257_v49, %v256_v54  ;;  %v2250_v49 = vld [vmem:[#allocation8 + $0x1f8] sm:$0xff] }
  0xc6   :  { %1546 = vtanh.f32 %v2174_v58 }
  0xc7   :  { %v1545_v56 = vpop.eup %1544 }
  0xc8   :  { %v254_v48 = vadd.f32 1.0, %v1545_v56 }
  0xca   :  { %v255_v57 = vmul.f32 0.5, %v254_v48 }
  0xcc   :  { %v1547_v63 = vpop.eup %1546 }
  0xcd   :  { %v260_v62 = vmul.f32 %v1547_v63, %v255_v57  ;;  %v438_v63 = vld [vmem:[#allocation2 + $0x50] sm:$0xff] }
  0xcf   :  { %261 = vst [vmem:[#allocation10] sm:$0xff] %v260_v62  ;;  %347 = vmatmul.f32.vlgmr.msrb.gmra.mxu0 %v260_v62  ;;  %367 = vmatmul.f32.vlgmr.msrb.gmra.mxu1 %v260_v62 }
  0xd0   :  { %387 = vmatmul.f32.vlgmr.msrb.gmra.mxu2 %v260_v62  ;;  %407 = vmatmul.f32.vlgmr.msrb.gmra.mxu3 %v260_v62  ;;  %v439_v62 = vld [vmem:[#allocation2 + $0x58] sm:$0xff] }
  0xd1   :  { %677 = vmatpush.msrb.mxu0 %v1854_v0  ;;  %697 = vmatpush.msrb.mxu1 %v1856_v1  ;;  %v2737_v0 = vld [vmem:[#allocation19_spill] sm:$0xff]  ;;  %v2738_v1 = vld [vmem:[#allocation20_spill] sm:$0xff] }
  0xd2   :  { %717 = vmatpush.msrb.mxu2 %v1858_v2  ;;  %737 = vmatpush.msrb.mxu3 %v1877_v9  ;;  %v2739_v2 = vld [vmem:[#allocation21_spill] sm:$0xff]  ;;  %v2746_v9 = vld [vmem:[#allocation27_spill] sm:$0xff]  ;;  %2757 = vst [vmem:[#allocation19_spill] sm:$0xff] %v2242_v61 }
  0xd3   :  { %678 = vmatpush.msrb.mxu0 %v1862_v3  ;;  %698 = vmatpush.msrb.mxu1 %v1864_v4  ;;  %v2740_v3 = vld [vmem:[#allocation25_spill] sm:$0xff]  ;;  %v2741_v4 = vld [vmem:[#allocation22_spill] sm:$0xff] }
  0xd4   :  { %718 = vmatpush.msrb.mxu2 %v1866_v5  ;;  %738 = vmatpush.msrb.mxu3 %v1885_v12  ;;  %v2742_v5 = vld [vmem:[#allocation23_spill] sm:$0xff]  ;;  %v2749_v12 = vld [vmem:[#allocation30_spill] sm:$0xff] }
  0xd5   :  { %679 = vmatpush.msrb.mxu0 %v1869_v6  ;;  %699 = vmatpush.msrb.mxu1 %v1871_v7  ;;  %v2743_v6 = vld [vmem:[#allocation24_spill] sm:$0xff]  ;;  %v2744_v7 = vld [vmem:[#allocation29_spill] sm:$0xff] }
  0xd6   :  { %719 = vmatpush.msrb.mxu2 %v1875_v8  ;;  %739 = vmatpush.msrb.mxu3 %v1891_v14  ;;  %v2745_v8 = vld [vmem:[#allocation26_spill] sm:$0xff]  ;;  %v2751_v14 = vld [vmem:[#allocation32_spill] sm:$0xff] }
  0xd7   :  { %680 = vmatpush.msrb.mxu0 %v1881_v10  ;;  %700 = vmatpush.msrb.mxu1 %v1883_v11  ;;  %v2747_v10 = vld [vmem:[#allocation28_spill] sm:$0xff]  ;;  %v2748_v11 = vld [vmem:[#allocation33_spill] sm:$0xff] }
  0xd8   :  { %720 = vmatpush.msrb.mxu2 %v1889_v13  ;;  %740 = vmatpush.msrb.mxu3 %v1903_v18  ;;  %v2750_v13 = vld [vmem:[#allocation31_spill] sm:$0xff]  ;;  %v2755_v18 = vld [vmem:[#allocation36_spill] sm:$0xff] }
  0xd9   :  { %681 = vmatpush.msrb.mxu0 %v1895_v15  ;;  %701 = vmatpush.msrb.mxu1 %v1897_v16  ;;  %v2752_v15 = vld [vmem:[#allocation37_spill] sm:$0xff]  ;;  %v2753_v16 = vld [vmem:[#allocation34_spill] sm:$0xff] }
  0xda   :  { %721 = vmatpush.msrb.mxu2 %v1901_v17  ;;  %741 = vmatpush.msrb.mxu3 %v1915_v22  ;;  %v2754_v17 = vld [vmem:[#allocation35_spill] sm:$0xff] }
  0xdb   :  { %682 = vmatpush.msrb.mxu0 %v1907_v19  ;;  %702 = vmatpush.msrb.mxu1 %v1909_v20  ;;  %v2756_v19 = vld [vmem:[#allocation38_spill] sm:$0xff]  ;;  %v263_v20 = vld [vmem:[#allocation2 + $0x20] sm:$0xff] }
  0xdc   :  { %722 = vmatpush.msrb.mxu2 %v1913_v21  ;;  %742 = vmatpush.msrb.mxu3 %v1927_v26  ;;  %v264_v21 = vld [vmem:[#allocation2 + $0x28] sm:$0xff] }
  0xdd   :  { %683 = vmatpush.msrb.mxu0 %v1919_v23  ;;  %703 = vmatpush.msrb.mxu1 %v1921_v24 }
  0xde   :  { %723 = vmatpush.msrb.mxu2 %v1925_v25  ;;  %743 = vmatpush.msrb.mxu3 %v1939_v30 }
  0xdf   :  { %684 = vmatpush.msrb.mxu0 %v1931_v27  ;;  %704 = vmatpush.msrb.mxu1 %v1933_v28  ;;  %v265_v28 = vld [vmem:[#allocation2 + $0x30] sm:$0xff] }
  0xe0   :  { %724 = vmatpush.msrb.mxu2 %v1937_v29  ;;  %744 = vmatpush.msrb.mxu3 %v1951_v34  ;;  %v266_v29 = vld [vmem:[#allocation2 + $0x38] sm:$0xff] }
  0xe1   :  { %685 = vmatpush.msrb.mxu0 %v1943_v31  ;;  %705 = vmatpush.msrb.mxu1 %v1945_v32 }
  0xe2   :  { %725 = vmatpush.msrb.mxu2 %v1949_v33  ;;  %745 = vmatpush.msrb.mxu3 %v1963_v38 }
  0xe3   :  { %686 = vmatpush.msrb.mxu0 %v1955_v35  ;;  %706 = vmatpush.msrb.mxu1 %v1957_v36 }
  0xe4   :  { %726 = vmatpush.msrb.mxu2 %v1961_v37  ;;  %746 = vmatpush.msrb.mxu3 %v1975_v42 }
  0xe5   :  { %687 = vmatpush.msrb.mxu0 %v1967_v39  ;;  %707 = vmatpush.msrb.mxu1 %v1969_v40 }
  0xe6   :  { %727 = vmatpush.msrb.mxu2 %v1973_v41  ;;  %747 = vmatpush.msrb.mxu3 %v1987_v46 }
  0xe7   :  { %688 = vmatpush.msrb.mxu0 %v2737_v0  ;;  %708 = vmatpush.msrb.mxu1 %v2738_v1 }
  0xe8   :  { %728 = vmatpush.msrb.mxu2 %v2739_v2  ;;  %748 = vmatpush.msrb.mxu3 %v2740_v3 }
  0xe9   :  { %689 = vmatpush.msrb.mxu0 %v2741_v4  ;;  %709 = vmatpush.msrb.mxu1 %v2742_v5 }
  0xea   :  { %729 = vmatpush.msrb.mxu2 %v2743_v6  ;;  %749 = vmatpush.msrb.mxu3 %v2744_v7 }
  0xeb   :  { %690 = vmatpush.msrb.mxu0 %v2745_v8  ;;  %710 = vmatpush.msrb.mxu1 %v2746_v9 }
  0xec   :  { %730 = vmatpush.msrb.mxu2 %v2747_v10  ;;  %750 = vmatpush.msrb.mxu3 %v2748_v11 }
  0xed   :  { %691 = vmatpush.msrb.mxu0 %v2749_v12  ;;  %711 = vmatpush.msrb.mxu1 %v2750_v13 }
  0xee   :  { %731 = vmatpush.msrb.mxu2 %v2751_v14  ;;  %751 = vmatpush.msrb.mxu3 %v2752_v15 }
  0xef   :  { %692 = vmatpush.msrb.mxu0 %v2753_v16  ;;  %712 = vmatpush.msrb.mxu1 %v2754_v17 }
  0xf0   :  { %732 = vmatpush.msrb.mxu2 %v2755_v18  ;;  %752 = vmatpush.msrb.mxu3 %v2756_v19 }
 0x14c   :  { %v348_v22 = vpop.f32.mrf.mxu0  ;;  %v368_v23 = vpop.f32.mrf.mxu1 }
 0x14d   :  { %v411_v24 = vadd.f32 %v348_v22, %v263_v20  ;;  %v412_v25 = vadd.f32 %v368_v23, %v264_v21  ;;  %v2257_v20 = vld [vmem:[#allocation8 + $0x1c0] sm:$0xff]  ;;  %v2259_v21 = vld [vmem:[#allocation8 + $0x1c8] sm:$0xff]  ;;  %v2261_v22 = vld [vmem:[#allocation8 + $0x1d0] sm:$0xff] }
 0x14e   :  { %v2265_v23 = vld [vmem:[#allocation8 + $0x1d8] sm:$0xff] }
 0x14f   :  { %v415_v26 = vmul.f32 0.5, %v411_v24  ;;  %v419_v27 = vmul.f32 0.5, %v412_v25  ;;  %v2269_v24 = vld [vmem:[#allocation8 + $0x1a0] sm:$0xff]  ;;  %v2271_v25 = vld [vmem:[#allocation8 + $0x1a8] sm:$0xff] }
 0x151   :  { %1548 = vtanh.f32 %v415_v26  ;;  %v2273_v26 = vld [vmem:[#allocation8 + $0x1b0] sm:$0xff] }
 0x152   :  { %1550 = vtanh.f32 %v419_v27  ;;  %v2277_v27 = vld [vmem:[#allocation8 + $0x1b8] sm:$0xff] }
 0x153   :  { %v388_v30 = vpop.f32.mrf.mxu2  ;;  %v408_v31 = vpop.f32.mrf.mxu3 }
 0x154   :  { %v413_v32 = vadd.f32 %v388_v30, %v265_v28  ;;  %v414_v33 = vadd.f32 %v408_v31, %v266_v29  ;;  %v2281_v28 = vld [vmem:[#allocation8 + $0x180] sm:$0xff]  ;;  %v2283_v29 = vld [vmem:[#allocation8 + $0x188] sm:$0xff]  ;;  %v2285_v30 = vld [vmem:[#allocation8 + $0x190] sm:$0xff] }
 0x155   :  { %v2289_v31 = vld [vmem:[#allocation8 + $0x198] sm:$0xff] }
 0x156   :  { %1552 = vtanh.f32 %v413_v32  ;;  %v424_v34 = vmul.f32 0.5, %v414_v33  ;;  %v2293_v32 = vld [vmem:[#allocation8 + $0x160] sm:$0xff]  ;;  %v2295_v33 = vld [vmem:[#allocation8 + $0x168] sm:$0xff] }
 0x157   :  { %v1549_v35 = vpop.eup %1548 }
 0x158   :  { %v1551_v36 = vpop.eup %1550  ;;  %v417_v37 = vadd.f32 1.0, %v1549_v35  ;;  %1554 = vtanh.f32 %v424_v34  ;;  %v2297_v34 = vld [vmem:[#allocation8 + $0x170] sm:$0xff]  ;;  %v2301_v35 = vld [vmem:[#allocation8 + $0x178] sm:$0xff] }
 0x159   :  { %v421_v38 = vadd.f32 1.0, %v1551_v36  ;;  %v2305_v36 = vld [vmem:[#allocation8 + $0x140] sm:$0xff] }
 0x15a   :  { %v418_v39 = vmul.f32 0.5, %v417_v37  ;;  %v2307_v37 = vld [vmem:[#allocation8 + $0x148] sm:$0xff] }
 0x15b   :  { %v422_v40 = vmul.f32 0.5, %v421_v38  ;;  %v2309_v38 = vld [vmem:[#allocation8 + $0x150] sm:$0xff] }
 0x15c   :  { %v1553_v41 = vpop.eup %1552 }
 0x15d   :  { %v428_v42 = vmul.f32 %v422_v40, %v2174_v58  ;;  %v429_v43 = vmul.f32 %v1553_v41, %v418_v39  ;;  %v2313_v39 = vld [vmem:[#allocation8 + $0x158] sm:$0xff]  ;;  %v2317_v40 = vld [vmem:[#allocation8 + $0x120] sm:$0xff]  ;;  %v2319_v41 = vld [vmem:[#allocation8 + $0x128] sm:$0xff] }
 0x15e   :  { %v1555_v44 = vpop.eup %1554 }
 0x15f   :  { %v430_v45 = vadd.f32 %v429_v43, %v428_v42  ;;  %v426_v46 = vadd.f32 1.0, %v1555_v44  ;;  %v2321_v42 = vld [vmem:[#allocation8 + $0x130] sm:$0xff]  ;;  %v2325_v43 = vld [vmem:[#allocation8 + $0x138] sm:$0xff]  ;;  %v2329_v44 = vld [vmem:[#allocation8 + $0x100] sm:$0xff] }
 0x161   :  { %1556 = vtanh.f32 %v430_v45  ;;  %v427_v47 = vmul.f32 0.5, %v426_v46  ;;  %v2333_v46 = vld [vmem:[#allocation8 + $0x110] sm:$0xff] }
 0x167   :  { %v1557_v50 = vpop.eup %1556 }
 0x168   :  { %v432_v55 = vmul.f32 %v1557_v50, %v427_v47  ;;  %v2337_v47 = vld [vmem:[#allocation8 + $0x118] sm:$0xff]  ;;  %v2341_v50 = vld [vmem:[#allocation8 + $0xe0] sm:$0xff] }
 0x16a   :  { %434 = vst [vmem:[#allocation10 + $0x8] sm:$0xff] %v432_v55  ;;  %520 = vmatmul.f32.vlgmr.msra.gmra.mxu0 %v432_v55  ;;  %540 = vmatmul.f32.vlgmr.msra.gmra.mxu1 %v432_v55 }
 0x16b   :  { %560 = vmatmul.f32.vlgmr.msra.gmra.mxu2 %v432_v55  ;;  %580 = vmatmul.f32.vlgmr.msra.gmra.mxu3 %v432_v55  ;;  %v2343_v55 = vld [vmem:[#allocation8 + $0xe8] sm:$0xff] }
 0x16c   :  { %850 = vmatpush.msra.mxu0 %v2242_v61  ;;  %870 = vmatpush.msra.mxu1 %v2244_v51 }
 0x16d   :  { %890 = vmatpush.msra.mxu2 %v2246_v52  ;;  %910 = vmatpush.msra.mxu3 %v2250_v49 }
 0x16e   :  { %851 = vmatpush.msra.mxu0 %v2257_v20  ;;  %871 = vmatpush.msra.mxu1 %v2259_v21 }
 0x16f   :  { %891 = vmatpush.msra.mxu2 %v2261_v22  ;;  %911 = vmatpush.msra.mxu3 %v2265_v23 }
 0x170   :  { %852 = vmatpush.msra.mxu0 %v2269_v24  ;;  %872 = vmatpush.msra.mxu1 %v2271_v25 }
 0x171   :  { %892 = vmatpush.msra.mxu2 %v2273_v26  ;;  %912 = vmatpush.msra.mxu3 %v2277_v27 }
 0x172   :  { %853 = vmatpush.msra.mxu0 %v2281_v28  ;;  %873 = vmatpush.msra.mxu1 %v2283_v29 }
 0x173   :  { %893 = vmatpush.msra.mxu2 %v2285_v30  ;;  %913 = vmatpush.msra.mxu3 %v2289_v31 }
 0x174   :  { %854 = vmatpush.msra.mxu0 %v2293_v32  ;;  %874 = vmatpush.msra.mxu1 %v2295_v33 }
 0x175   :  { %894 = vmatpush.msra.mxu2 %v2297_v34  ;;  %914 = vmatpush.msra.mxu3 %v2301_v35 }
 0x176   :  { %855 = vmatpush.msra.mxu0 %v2305_v36  ;;  %875 = vmatpush.msra.mxu1 %v2307_v37 }
 0x177   :  { %895 = vmatpush.msra.mxu2 %v2309_v38  ;;  %915 = vmatpush.msra.mxu3 %v2313_v39 }
 0x178   :  { %856 = vmatpush.msra.mxu0 %v2317_v40  ;;  %876 = vmatpush.msra.mxu1 %v2319_v41 }
 0x179   :  { %896 = vmatpush.msra.mxu2 %v2321_v42  ;;  %916 = vmatpush.msra.mxu3 %v2325_v43 }
 0x17a   :  { %857 = vmatpush.msra.mxu0 %v2329_v44 }
 0x17b   :  { %897 = vmatpush.msra.mxu2 %v2333_v46  ;;  %917 = vmatpush.msra.mxu3 %v2337_v47 }
 0x17c   :  { %858 = vmatpush.msra.mxu0 %v2341_v50 }
 0x1e7   :  { %v521_v53 = vpop.f32.mrf.mxu0  ;;  %v541_v54 = vpop.f32.mrf.mxu1 }
 0x1e8   :  { %v584_v58 = vadd.f32 %v521_v53, %v436_v59  ;;  %v585_v56 = vadd.f32 %v541_v54, %v437_v60  ;;  %v2345_v59 = vld [vmem:[#allocation8 + $0xf0] sm:$0xff]  ;;  %v2349_v60 = vld [vmem:[#allocation8 + $0xf8] sm:$0xff]  ;;  %v2353_v53 = vld [vmem:[#allocation8 + $0xc0] sm:$0xff] }
 0x1e9   :  { %898 = vmatpush.msra.mxu2 %v2345_v59  ;;  %918 = vmatpush.msra.mxu3 %v2349_v60  ;;  %v2355_v54 = vld [vmem:[#allocation8 + $0xc8] sm:$0xff] }
 0x1ea   :  { %v588_v48 = vmul.f32 0.5, %v584_v58  ;;  %v592_v57 = vmul.f32 0.5, %v585_v56  ;;  %v2357_v58 = vld [vmem:[#allocation8 + $0xd0] sm:$0xff]  ;;  %859 = vmatpush.msra.mxu0 %v2353_v53  ;;  %v2361_v56 = vld [vmem:[#allocation8 + $0xd8] sm:$0xff] }
 0x1eb   :  { %899 = vmatpush.msra.mxu2 %v2357_v58  ;;  %919 = vmatpush.msra.mxu3 %v2361_v56 }
 0x1ec   :  { %1558 = vtanh.f32 %v588_v48  ;;  %v2365_v48 = vld [vmem:[#allocation8 + $0xa0] sm:$0xff] }
 0x1ed   :  { %1560 = vtanh.f32 %v592_v57  ;;  %v2367_v57 = vld [vmem:[#allocation8 + $0xa8] sm:$0xff]  ;;  %860 = vmatpush.msra.mxu0 %v2365_v48 }
 0x1ee   :  { %v561_v0 = vpop.f32.mrf.mxu2  ;;  %v581_v1 = vpop.f32.mrf.mxu3 }
 0x1ef   :  { %v586_v2 = vadd.f32 %v561_v0, %v438_v63  ;;  %v587_v3 = vadd.f32 %v581_v1, %v439_v62  ;;  %v2369_v63 = vld [vmem:[#allocation8 + $0xb0] sm:$0xff]  ;;  %v2373_v62 = vld [vmem:[#allocation8 + $0xb8] sm:$0xff]  ;;  %v2377_v0 = vld [vmem:[#allocation8 + $0x80] sm:$0xff] }
 0x1f0   :  { %900 = vmatpush.msra.mxu2 %v2369_v63  ;;  %920 = vmatpush.msra.mxu3 %v2373_v62  ;;  %2758 = vst [vmem:[#allocation20_spill] sm:$0xff] %v2377_v0  ;;  %v2379_v1 = vld [vmem:[#allocation8 + $0x88] sm:$0xff] }
 0x1f1   :  { %1562 = vtanh.f32 %v586_v2  ;;  %v597_v4 = vmul.f32 0.5, %v587_v3  ;;  %2759 = vst [vmem:[#allocation21_spill] sm:$0xff] %v2379_v1  ;;  %v2381_v2 = vld [vmem:[#allocation8 + $0x90] sm:$0xff]  ;;  %861 = vmatpush.msra.mxu0 %v2377_v0  ;;  %v2385_v3 = vld [vmem:[#allocation8 + $0x98] sm:$0xff] }
 0x1f2   :  { %v1559_v5 = vpop.eup %1558  ;;  %2760 = vst [vmem:[#allocation25_spill] sm:$0xff] %v2381_v2  ;;  %901 = vmatpush.msra.mxu2 %v2381_v2  ;;  %921 = vmatpush.msra.mxu3 %v2385_v3 }
 0x1f3   :  { %v1561_v6 = vpop.eup %1560  ;;  %v590_v7 = vadd.f32 1.0, %v1559_v5  ;;  %1564 = vtanh.f32 %v597_v4  ;;  %2761 = vst [vmem:[#allocation22_spill] sm:$0xff] %v2385_v3  ;;  %v2389_v4 = vld [vmem:[#allocation8 + $0x60] sm:$0xff]  ;;  %v2391_v5 = vld [vmem:[#allocation8 + $0x68] sm:$0xff] }
 0x1f4   :  { %v594_v8 = vadd.f32 1.0, %v1561_v6  ;;  %2762 = vst [vmem:[#allocation23_spill] sm:$0xff] %v2389_v4  ;;  %v2393_v6 = vld [vmem:[#allocation8 + $0x70] sm:$0xff]  ;;  %862 = vmatpush.msra.mxu0 %v2389_v4 }
 0x1f5   :  { %v591_v9 = vmul.f32 0.5, %v590_v7  ;;  %2763 = vst [vmem:[#allocation24_spill] sm:$0xff] %v2391_v5  ;;  %v2397_v7 = vld [vmem:[#allocation8 + $0x78] sm:$0xff]  ;;  %902 = vmatpush.msra.mxu2 %v2393_v6 }
 0x1f6   :  { %v595_v10 = vmul.f32 0.5, %v594_v8  ;;  %2764 = vst [vmem:[#allocation29_spill] sm:$0xff] %v2393_v6  ;;  %922 = vmatpush.msra.mxu3 %v2397_v7  ;;  %v2401_v8 = vld [vmem:[#allocation8 + $0x40] sm:$0xff] }
 0x1f7   :  { %v1563_v11 = vpop.eup %1562  ;;  %2765 = vst [vmem:[#allocation26_spill] sm:$0xff] %v2397_v7  ;;  %863 = vmatpush.msra.mxu0 %v2401_v8 }
 0x1f8   :  { %v601_v12 = vmul.f32 %v595_v10, %v430_v45  ;;  %v602_v13 = vmul.f32 %v1563_v11, %v591_v9  ;;  %v2331_v45 = vld [vmem:[#allocation8 + $0x108] sm:$0xff]  ;;  %2766 = vst [vmem:[#allocation27_spill] sm:$0xff] %v2401_v8  ;;  %v2405_v10 = vld [vmem:[#allocation8 + $0x50] sm:$0xff]  ;;  %v2409_v11 = vld [vmem:[#allocation8 + $0x58] sm:$0xff] }
 0x1f9   :  { %v1565_v14 = vpop.eup %1564  ;;  %877 = vmatpush.msra.mxu1 %v2331_v45  ;;  %v2403_v9 = vld [vmem:[#allocation8 + $0x48] sm:$0xff]  ;;  %2768 = vst [vmem:[#allocation33_spill] sm:$0xff] %v2405_v10  ;;  %903 = vmatpush.msra.mxu2 %v2405_v10 }
 0x1fa   :  { %v2254_v15 = vadd.f32 %v602_v13, %v601_v12  ;;  %v599_v16 = vadd.f32 1.0, %v1565_v14  ;;  %2767 = vst [vmem:[#allocation28_spill] sm:$0xff] %v2403_v9  ;;  %923 = vmatpush.msra.mxu3 %v2409_v11  ;;  %v2413_v12 = vld [vmem:[#allocation8 + $0x20] sm:$0xff]  ;;  %v2415_v13 = vld [vmem:[#allocation8 + $0x28] sm:$0xff]  ;;  %v2417_v14 = vld [vmem:[#allocation8 + $0x30] sm:$0xff] }
 0x1fb   :  { %878 = vmatpush.msra.mxu1 %v2343_v55  ;;  %2769 = vst [vmem:[#allocation30_spill] sm:$0xff] %v2409_v11  ;;  %864 = vmatpush.msra.mxu0 %v2413_v12  ;;  %v2433_v11 = vld [vmem:[#allocation8 + $0x18] sm:$0xff] }
 0x1fc   :  { %1566 = vtanh.f32 %v2254_v15  ;;  %v600_v17 = vmul.f32 0.5, %v599_v16  ;;  %2770 = vst [vmem:[#allocation31_spill] sm:$0xff] %v2413_v12  ;;  %v2421_v16 = vld [vmem:[#allocation8 + $0x38] sm:$0xff]  ;;  %904 = vmatpush.msra.mxu2 %v2417_v14  ;;  %v609_v12 = vld [vmem:[#allocation2 + $0x60] sm:$0xff] }
 0x1fd   :  { %879 = vmatpush.msra.mxu1 %v2355_v54  ;;  %2771 = vst [vmem:[#allocation32_spill] sm:$0xff] %v2415_v13  ;;  %924 = vmatpush.msra.mxu3 %v2421_v16 }
 0x1fe   :  { %2772 = vst [vmem:[#allocation37_spill] sm:$0xff] %v2417_v14 }
 0x1ff   :  { %880 = vmatpush.msra.mxu1 %v2367_v57  ;;  %2773 = vst [vmem:[#allocation34_spill] sm:$0xff] %v2421_v16  ;;  %925 = vmatpush.msra.mxu3 %v2433_v11 }
 0x200   :  { %2777 = vst [vmem:[#allocation39_spill] sm:$0xff] %v2433_v11 }
 0x201   :  { %881 = vmatpush.msra.mxu1 %v2379_v1 }
 0x202   :  { %v1567_v18 = vpop.eup %1566 }
 0x203   :  { %v605_v19 = vmul.f32 %v1567_v18, %v600_v17  ;;  %882 = vmatpush.msra.mxu1 %v2391_v5  ;;  %v2425_v17 = vld [vmem:[#allocation8] sm:$0xff]  ;;  %v2427_v18 = vld [vmem:[#allocation8 + $0x8] sm:$0xff] }
 0x204   :  { %2774 = vst [vmem:[#allocation35_spill] sm:$0xff] %v2425_v17  ;;  %865 = vmatpush.msra.mxu0 %v2425_v17 }
 0x205   :  { %607 = vst [vmem:[#allocation10 + $0x10] sm:$0xff] %v605_v19  ;;  %693 = vmatmul.f32.vlgmr.msrb.gmra.mxu0 %v605_v19  ;;  %713 = vmatmul.f32.vlgmr.msrb.gmra.mxu1 %v605_v19 }
 0x206   :  { %733 = vmatmul.f32.vlgmr.msrb.gmra.mxu2 %v605_v19  ;;  %753 = vmatmul.f32.vlgmr.msrb.gmra.mxu3 %v605_v19  ;;  %2775 = vst [vmem:[#allocation36_spill] sm:$0xff] %v2427_v18  ;;  %v2429_v19 = vld [vmem:[#allocation8 + $0x10] sm:$0xff] }
 0x207   :  { %883 = vmatpush.msra.mxu1 %v2403_v9  ;;  %2776 = vst [vmem:[#allocation38_spill] sm:$0xff] %v2429_v19  ;;  %905 = vmatpush.msra.mxu2 %v2429_v19 }
 0x208   :  { %1023 = vmatpush.msrb.mxu0 %v2242_v61  ;;  %1083 = vmatpush.msrb.mxu3 %v2250_v49 }
 0x209   :  { %884 = vmatpush.msra.mxu1 %v2415_v13  ;;  %v610_v13 = vld [vmem:[#allocation2 + $0x68] sm:$0xff]  ;;  %1063 = vmatpush.msrb.mxu2 %v2246_v52 }
 0x20a   :  { %1024 = vmatpush.msrb.mxu0 %v2257_v20  ;;  %1084 = vmatpush.msrb.mxu3 %v2265_v23 }
 0x20b   :  { %885 = vmatpush.msra.mxu1 %v2427_v18  ;;  %1064 = vmatpush.msrb.mxu2 %v2261_v22 }
 0x20c   :  { %1025 = vmatpush.msrb.mxu0 %v2269_v24  ;;  %1085 = vmatpush.msrb.mxu3 %v2277_v27 }
 0x20d   :  { %1043 = vmatpush.msrb.mxu1 %v2244_v51  ;;  %1065 = vmatpush.msrb.mxu2 %v2273_v26 }
 0x20e   :  { %1026 = vmatpush.msrb.mxu0 %v2281_v28  ;;  %1086 = vmatpush.msrb.mxu3 %v2289_v31 }
 0x20f   :  { %1044 = vmatpush.msrb.mxu1 %v2259_v21  ;;  %1066 = vmatpush.msrb.mxu2 %v2285_v30 }
 0x210   :  { %1027 = vmatpush.msrb.mxu0 %v2293_v32  ;;  %1087 = vmatpush.msrb.mxu3 %v2301_v35 }
 0x211   :  { %1045 = vmatpush.msrb.mxu1 %v2271_v25  ;;  %1067 = vmatpush.msrb.mxu2 %v2297_v34 }
 0x212   :  { %1028 = vmatpush.msrb.mxu0 %v2305_v36  ;;  %1088 = vmatpush.msrb.mxu3 %v2313_v39 }
 0x213   :  { %1046 = vmatpush.msrb.mxu1 %v2283_v29  ;;  %1068 = vmatpush.msrb.mxu2 %v2309_v38 }
 0x214   :  { %1029 = vmatpush.msrb.mxu0 %v2317_v40  ;;  %1089 = vmatpush.msrb.mxu3 %v2325_v43 }
 0x215   :  { %1047 = vmatpush.msrb.mxu1 %v2295_v33  ;;  %1069 = vmatpush.msrb.mxu2 %v2321_v42 }
 0x216   :  { %1030 = vmatpush.msrb.mxu0 %v2329_v44  ;;  %1090 = vmatpush.msrb.mxu3 %v2337_v47 }
 0x217   :  { %1048 = vmatpush.msrb.mxu1 %v2307_v37  ;;  %1070 = vmatpush.msrb.mxu2 %v2333_v46 }
 0x218   :  { %1031 = vmatpush.msrb.mxu0 %v2341_v50  ;;  %1091 = vmatpush.msrb.mxu3 %v2349_v60 }
 0x219   :  { %1049 = vmatpush.msrb.mxu1 %v2319_v41  ;;  %1071 = vmatpush.msrb.mxu2 %v2345_v59 }
 0x21a   :  { %1032 = vmatpush.msrb.mxu0 %v2353_v53  ;;  %1092 = vmatpush.msrb.mxu3 %v2361_v56 }
 0x21b   :  { %1050 = vmatpush.msrb.mxu1 %v2331_v45  ;;  %1072 = vmatpush.msrb.mxu2 %v2357_v58 }
 0x21c   :  { %1033 = vmatpush.msrb.mxu0 %v2365_v48  ;;  %1093 = vmatpush.msrb.mxu3 %v2373_v62 }
 0x21d   :  { %1051 = vmatpush.msrb.mxu1 %v2343_v55  ;;  %1073 = vmatpush.msrb.mxu2 %v2369_v63 }
 0x21e   :  { %1034 = vmatpush.msrb.mxu0 %v2377_v0  ;;  %1094 = vmatpush.msrb.mxu3 %v2385_v3 }
 0x21f   :  { %1052 = vmatpush.msrb.mxu1 %v2355_v54  ;;  %1074 = vmatpush.msrb.mxu2 %v2381_v2 }
 0x220   :  { %1035 = vmatpush.msrb.mxu0 %v2389_v4  ;;  %1095 = vmatpush.msrb.mxu3 %v2397_v7  ;;  %v2784_v7 = vld [vmem:[#allocation35_spill] sm:$0xff] }
 0x221   :  { %1053 = vmatpush.msrb.mxu1 %v2367_v57  ;;  %1075 = vmatpush.msrb.mxu2 %v2393_v6 }
 0x222   :  { %1036 = vmatpush.msrb.mxu0 %v2401_v8  ;;  %v2785_v8 = vld [vmem:[#allocation36_spill] sm:$0xff] }
 0x223   :  { %1054 = vmatpush.msrb.mxu1 %v2379_v1  ;;  %1076 = vmatpush.msrb.mxu2 %v2405_v10 }
 0x225   :  { %1055 = vmatpush.msrb.mxu1 %v2391_v5 }
 0x227   :  { %1056 = vmatpush.msrb.mxu1 %v2403_v9 }
 0x282   :  { %v694_v16 = vpop.f32.mrf.mxu0  ;;  %v714_v14 = vpop.f32.mrf.mxu1 }
 0x283   :  { %v757_v17 = vadd.f32 %v694_v16, %v609_v12  ;;  %v758_v18 = vadd.f32 %v714_v14, %v610_v13  ;;  %v611_v12 = vld [vmem:[#allocation2 + $0x70] sm:$0xff]  ;;  %v612_v13 = vld [vmem:[#allocation2 + $0x78] sm:$0xff] }
 0x285   :  { %v761_v11 = vmul.f32 0.5, %v757_v17  ;;  %v765_v61 = vmul.f32 0.5, %v758_v18 }
 0x287   :  { %1568 = vtanh.f32 %v761_v11 }
 0x288   :  { %1570 = vtanh.f32 %v765_v61 }
 0x289   :  { %v734_v14 = vpop.f32.mrf.mxu2  ;;  %v754_v16 = vpop.f32.mrf.mxu3 }
 0x28a   :  { %v759_v17 = vadd.f32 %v734_v14, %v611_v12  ;;  %v760_v18 = vadd.f32 %v754_v16, %v612_v13 }
 0x28c   :  { %1572 = vtanh.f32 %v759_v17  ;;  %v770_v61 = vmul.f32 0.5, %v760_v18 }
 0x28d   :  { %v1569_v11 = vpop.eup %1568 }
 0x28e   :  { %v1571_v12 = vpop.eup %1570  ;;  %v763_v13 = vadd.f32 1.0, %v1569_v11  ;;  %1574 = vtanh.f32 %v770_v61 }
 0x28f   :  { %v767_v14 = vadd.f32 1.0, %v1571_v12 }
 0x290   :  { %v764_v16 = vmul.f32 0.5, %v763_v13 }
 0x291   :  { %v768_v17 = vmul.f32 0.5, %v767_v14 }
 0x292   :  { %v1573_v18 = vpop.eup %1572 }
 0x293   :  { %v774_v61 = vmul.f32 %v768_v17, %v2254_v15  ;;  %v775_v11 = vmul.f32 %v1573_v18, %v764_v16  ;;  %v2779_v16 = vld [vmem:[#allocation30_spill] sm:$0xff]  ;;  %v2780_v18 = vld [vmem:[#allocation31_spill] sm:$0xff] }
 0x294   :  { %v1575_v12 = vpop.eup %1574  ;;  %1096 = vmatpush.msrb.mxu3 %v2779_v16  ;;  %1037 = vmatpush.msrb.mxu0 %v2780_v18  ;;  %v2787_v18 = vld [vmem:[#allocation19_spill] sm:$0xff] }
 0x295   :  { %v2478_v13 = vadd.f32 %v775_v11, %v774_v61  ;;  %v772_v15 = vadd.f32 1.0, %v1575_v12  ;;  %v2781_v61 = vld [vmem:[#allocation32_spill] sm:$0xff]  ;;  %v2782_v12 = vld [vmem:[#allocation37_spill] sm:$0xff] }
 0x296   :  { %1057 = vmatpush.msrb.mxu1 %v2781_v61  ;;  %1077 = vmatpush.msrb.mxu2 %v2782_v12 }
 0x297   :  { %2778 = vst [vmem:[#allocation40_spill] sm:$0xff] %v2478_v13  ;;  %1576 = vtanh.f32 %v2478_v13  ;;  %v773_v14 = vmul.f32 0.5, %v772_v15  ;;  %v2783_v13 = vld [vmem:[#allocation34_spill] sm:$0xff]  ;;  %1038 = vmatpush.msrb.mxu0 %v2784_v7  ;;  %v2786_v15 = vld [vmem:[#allocation39_spill] sm:$0xff] }
 0x298   :  { %1097 = vmatpush.msrb.mxu3 %v2783_v13  ;;  %1058 = vmatpush.msrb.mxu1 %v2785_v8 }
 0x299   :  { %1078 = vmatpush.msrb.mxu2 %v2429_v19 }
 0x29a   :  { %1098 = vmatpush.msrb.mxu3 %v2786_v15 }
 0x29d   :  { %v1577_v17 = vpop.eup %1576 }
 0x29e   :  { %v778_v11 = vmul.f32 %v1577_v17, %v773_v14  ;;  %v2788_v14 = vld [vmem:[#allocation26_spill] sm:$0xff]  ;;  %v2789_v17 = vld [vmem:[#allocation27_spill] sm:$0xff] }
 0x2a0   :  { %780 = vst [vmem:[#allocation10 + $0x18] sm:$0xff] %v778_v11  ;;  %866 = vmatmul.f32.vlgmr.msra.gmra.mxu0 %v778_v11  ;;  %886 = vmatmul.f32.vlgmr.msra.gmra.mxu1 %v778_v11 }
 0x2a1   :  { %906 = vmatmul.f32.vlgmr.msra.gmra.mxu2 %v778_v11  ;;  %926 = vmatmul.f32.vlgmr.msra.gmra.mxu3 %v778_v11  ;;  %v2790_v11 = vld [vmem:[#allocation31_spill] sm:$0xff] }
 0x2a2   :  { %1196 = vmatpush.msra.mxu0 %v2787_v18  ;;  %1216 = vmatpush.msra.mxu1 %v2244_v51 }
 0x2a3   :  { %1236 = vmatpush.msra.mxu2 %v2246_v52  ;;  %1256 = vmatpush.msra.mxu3 %v2250_v49 }
 0x2a4   :  { %1197 = vmatpush.msra.mxu0 %v2257_v20  ;;  %1217 = vmatpush.msra.mxu1 %v2259_v21 }
 0x2a5   :  { %1237 = vmatpush.msra.mxu2 %v2261_v22  ;;  %1257 = vmatpush.msra.mxu3 %v2265_v23 }
 0x2a6   :  { %1198 = vmatpush.msra.mxu0 %v2269_v24  ;;  %1218 = vmatpush.msra.mxu1 %v2271_v25 }
 0x2a7   :  { %1238 = vmatpush.msra.mxu2 %v2273_v26  ;;  %1258 = vmatpush.msra.mxu3 %v2277_v27 }
 0x2a8   :  { %1199 = vmatpush.msra.mxu0 %v2281_v28  ;;  %1219 = vmatpush.msra.mxu1 %v2283_v29 }
 0x2a9   :  { %1239 = vmatpush.msra.mxu2 %v2285_v30  ;;  %1259 = vmatpush.msra.mxu3 %v2289_v31 }
 0x2aa   :  { %1200 = vmatpush.msra.mxu0 %v2293_v32  ;;  %1220 = vmatpush.msra.mxu1 %v2295_v33 }
 0x2ab   :  { %1240 = vmatpush.msra.mxu2 %v2297_v34  ;;  %1260 = vmatpush.msra.mxu3 %v2301_v35 }
 0x2ac   :  { %1201 = vmatpush.msra.mxu0 %v2305_v36  ;;  %1221 = vmatpush.msra.mxu1 %v2307_v37 }
 0x2ad   :  { %1241 = vmatpush.msra.mxu2 %v2309_v38  ;;  %1261 = vmatpush.msra.mxu3 %v2313_v39 }
 0x2ae   :  { %1202 = vmatpush.msra.mxu0 %v2317_v40  ;;  %1222 = vmatpush.msra.mxu1 %v2319_v41 }
 0x2af   :  { %1242 = vmatpush.msra.mxu2 %v2321_v42  ;;  %1262 = vmatpush.msra.mxu3 %v2325_v43 }
 0x2b0   :  { %1203 = vmatpush.msra.mxu0 %v2329_v44  ;;  %1223 = vmatpush.msra.mxu1 %v2331_v45 }
 0x2b1   :  { %1243 = vmatpush.msra.mxu2 %v2333_v46  ;;  %1263 = vmatpush.msra.mxu3 %v2337_v47 }
 0x2b2   :  { %1204 = vmatpush.msra.mxu0 %v2341_v50  ;;  %1224 = vmatpush.msra.mxu1 %v2343_v55 }
 0x2b3   :  { %1244 = vmatpush.msra.mxu2 %v2345_v59  ;;  %1264 = vmatpush.msra.mxu3 %v2349_v60 }
 0x2b4   :  { %1205 = vmatpush.msra.mxu0 %v2353_v53  ;;  %1225 = vmatpush.msra.mxu1 %v2355_v54 }
 0x2b5   :  { %1245 = vmatpush.msra.mxu2 %v2357_v58  ;;  %1265 = vmatpush.msra.mxu3 %v2361_v56 }
 0x2b6   :  { %1206 = vmatpush.msra.mxu0 %v2365_v48  ;;  %1226 = vmatpush.msra.mxu1 %v2367_v57 }
 0x2b7   :  { %1246 = vmatpush.msra.mxu2 %v2369_v63  ;;  %1266 = vmatpush.msra.mxu3 %v2373_v62 }
 0x2b8   :  { %1207 = vmatpush.msra.mxu0 %v2377_v0  ;;  %1227 = vmatpush.msra.mxu1 %v2379_v1 }
 0x2b9   :  { %1247 = vmatpush.msra.mxu2 %v2381_v2  ;;  %1267 = vmatpush.msra.mxu3 %v2385_v3 }
 0x2ba   :  { %1208 = vmatpush.msra.mxu0 %v2389_v4  ;;  %1228 = vmatpush.msra.mxu1 %v2391_v5  ;;  %v785_v5 = vld [vmem:[#allocation2 + $0x98] sm:$0xff] }
 0x2bb   :  { %1248 = vmatpush.msra.mxu2 %v2393_v6  ;;  %1268 = vmatpush.msra.mxu3 %v2788_v14 }
 0x2bc   :  { %1209 = vmatpush.msra.mxu0 %v2789_v17  ;;  %1229 = vmatpush.msra.mxu1 %v2403_v9  ;;  %v782_v9 = vld [vmem:[#allocation2 + $0x80] sm:$0xff] }
 0x2bd   :  { %1249 = vmatpush.msra.mxu2 %v2405_v10  ;;  %1269 = vmatpush.msra.mxu3 %v2779_v16  ;;  %v783_v10 = vld [vmem:[#allocation2 + $0x88] sm:$0xff] }
 0x2be   :  { %1210 = vmatpush.msra.mxu0 %v2790_v11  ;;  %1230 = vmatpush.msra.mxu1 %v2781_v61 }
 0x2bf   :  { %1250 = vmatpush.msra.mxu2 %v2782_v12  ;;  %1270 = vmatpush.msra.mxu3 %v2783_v13  ;;  %v784_v12 = vld [vmem:[#allocation2 + $0x90] sm:$0xff] }
 0x2c0   :  { %1211 = vmatpush.msra.mxu0 %v2784_v7  ;;  %1231 = vmatpush.msra.mxu1 %v2785_v8 }
 0x2c1   :  { %1251 = vmatpush.msra.mxu2 %v2429_v19  ;;  %1271 = vmatpush.msra.mxu3 %v2786_v15 }
 0x31d   :  { %v867_v17 = vpop.f32.mrf.mxu0  ;;  %v887_v16 = vpop.f32.mrf.mxu1 }
 0x31e   :  { %v930_v14 = vadd.f32 %v867_v17, %v782_v9  ;;  %v931_v11 = vadd.f32 %v887_v16, %v783_v10  ;;  %v2791_v16 = vld [vmem:[#allocation40_spill] sm:$0xff] }
 0x320   :  { %v934_v6 = vmul.f32 0.5, %v930_v14  ;;  %v938_v61 = vmul.f32 0.5, %v931_v11 }
 0x322   :  { %1578 = vtanh.f32 %v934_v6 }
 0x323   :  { %1580 = vtanh.f32 %v938_v61  ;;  %v1128_v61 = vld [vmem:[#allocation2 + $0xc0] sm:$0xff] }
 0x324   :  { %v907_v13 = vpop.f32.mrf.mxu2  ;;  %v927_v7 = vpop.f32.mrf.mxu3 }
 0x325   :  { %v932_v4 = vadd.f32 %v907_v13, %v784_v12  ;;  %v933_v8 = vadd.f32 %v927_v7, %v785_v5  ;;  %v1129_v12 = vld [vmem:[#allocation2 + $0xc8] sm:$0xff] }
 0x327   :  { %1582 = vtanh.f32 %v932_v4  ;;  %v943_v19 = vmul.f32 0.5, %v933_v8 }
 0x328   :  { %v1579_v3 = vpop.eup %1578 }
 0x329   :  { %v1581_v15 = vpop.eup %1580  ;;  %v936_v2 = vadd.f32 1.0, %v1579_v3  ;;  %1584 = vtanh.f32 %v943_v19 }
 0x32a   :  { %v940_v1 = vadd.f32 1.0, %v1581_v15 }
 0x32b   :  { %v937_v0 = vmul.f32 0.5, %v936_v2 }
 0x32c   :  { %v941_v9 = vmul.f32 0.5, %v940_v1 }
 0x32d   :  { %v1583_v10 = vpop.eup %1582 }
 0x32e   :  { %v947_v14 = vmul.f32 %v941_v9, %v2791_v16  ;;  %v948_v6 = vmul.f32 %v1583_v10, %v937_v0 }
 0x32f   :  { %v1585_v17 = vpop.eup %1584 }
 0x330   :  { %v2570_v11 = vadd.f32 %v948_v6, %v947_v14  ;;  %v945_v13 = vadd.f32 1.0, %v1585_v17  ;;  %v1130_v17 = vld [vmem:[#allocation2 + $0xd0] sm:$0xff] }
 0x332   :  { %1586 = vtanh.f32 %v2570_v11  ;;  %v946_v5 = vmul.f32 0.5, %v945_v13 }
 0x338   :  { %v1587_v4 = vpop.eup %1586 }
 0x339   :  { %v951_v7 = vmul.f32 %v1587_v4, %v946_v5 }
 0x33b   :  { %953 = vst [vmem:[#allocation10 + $0x20] sm:$0xff] %v951_v7  ;;  %1039 = vmatmul.f32.vlgmr.msrb.gmra.mxu0 %v951_v7  ;;  %1059 = vmatmul.f32.vlgmr.msrb.gmra.mxu1 %v951_v7 }
 0x33c   :  { %1079 = vmatmul.f32.vlgmr.msrb.gmra.mxu2 %v951_v7  ;;  %1099 = vmatmul.f32.vlgmr.msrb.gmra.mxu3 %v951_v7 }
 0x33d   :  { %1369 = vmatpush.msrb.mxu0 %v2787_v18  ;;  %1389 = vmatpush.msrb.mxu1 %v2244_v51  ;;  %v2792_v51 = vld [vmem:[#allocation20_spill] sm:$0xff] }
 0x33e   :  { %1409 = vmatpush.msrb.mxu2 %v2246_v52  ;;  %1429 = vmatpush.msrb.mxu3 %v2250_v49  ;;  %v2793_v52 = vld [vmem:[#allocation21_spill] sm:$0xff] }
 0x33f   :  { %1370 = vmatpush.msrb.mxu0 %v2257_v20  ;;  %1390 = vmatpush.msrb.mxu1 %v2259_v21  ;;  %v2794_v49 = vld [vmem:[#allocation25_spill] sm:$0xff]  ;;  %v2795_v20 = vld [vmem:[#allocation22_spill] sm:$0xff]  ;;  %v2796_v21 = vld [vmem:[#allocation23_spill] sm:$0xff] }
 0x340   :  { %1410 = vmatpush.msrb.mxu2 %v2261_v22  ;;  %1430 = vmatpush.msrb.mxu3 %v2265_v23  ;;  %v2797_v22 = vld [vmem:[#allocation24_spill] sm:$0xff]  ;;  %v2798_v23 = vld [vmem:[#allocation29_spill] sm:$0xff] }
 0x341   :  { %1371 = vmatpush.msrb.mxu0 %v2269_v24  ;;  %1391 = vmatpush.msrb.mxu1 %v2271_v25  ;;  %v2799_v24 = vld [vmem:[#allocation26_spill] sm:$0xff]  ;;  %v2800_v25 = vld [vmem:[#allocation27_spill] sm:$0xff] }
 0x342   :  { %1411 = vmatpush.msrb.mxu2 %v2273_v26  ;;  %1431 = vmatpush.msrb.mxu3 %v2277_v27  ;;  %v2801_v26 = vld [vmem:[#allocation28_spill] sm:$0xff]  ;;  %v2802_v27 = vld [vmem:[#allocation33_spill] sm:$0xff] }
 0x343   :  { %1372 = vmatpush.msrb.mxu0 %v2281_v28  ;;  %1392 = vmatpush.msrb.mxu1 %v2283_v29  ;;  %v2803_v28 = vld [vmem:[#allocation30_spill] sm:$0xff]  ;;  %v2804_v29 = vld [vmem:[#allocation31_spill] sm:$0xff] }
 0x344   :  { %1412 = vmatpush.msrb.mxu2 %v2285_v30  ;;  %1432 = vmatpush.msrb.mxu3 %v2289_v31  ;;  %v2805_v30 = vld [vmem:[#allocation32_spill] sm:$0xff]  ;;  %v2806_v31 = vld [vmem:[#allocation37_spill] sm:$0xff] }
 0x345   :  { %1373 = vmatpush.msrb.mxu0 %v2293_v32  ;;  %1393 = vmatpush.msrb.mxu1 %v2295_v33  ;;  %v2807_v32 = vld [vmem:[#allocation34_spill] sm:$0xff]  ;;  %v2808_v33 = vld [vmem:[#allocation35_spill] sm:$0xff] }
 0x346   :  { %1413 = vmatpush.msrb.mxu2 %v2297_v34  ;;  %1433 = vmatpush.msrb.mxu3 %v2301_v35  ;;  %v2809_v34 = vld [vmem:[#allocation36_spill] sm:$0xff]  ;;  %v2810_v35 = vld [vmem:[#allocation38_spill] sm:$0xff] }
 0x347   :  { %1374 = vmatpush.msrb.mxu0 %v2305_v36  ;;  %1394 = vmatpush.msrb.mxu1 %v2307_v37  ;;  %v2811_v36 = vld [vmem:[#allocation39_spill] sm:$0xff] }
 0x348   :  { %1414 = vmatpush.msrb.mxu2 %v2309_v38  ;;  %1434 = vmatpush.msrb.mxu3 %v2313_v39  ;;  %v955_v37 = vld [vmem:[#allocation2 + $0xa0] sm:$0xff]  ;;  %v956_v38 = vld [vmem:[#allocation2 + $0xa8] sm:$0xff] }
 0x349   :  { %1375 = vmatpush.msrb.mxu0 %v2317_v40  ;;  %1395 = vmatpush.msrb.mxu1 %v2319_v41 }
 0x34a   :  { %1415 = vmatpush.msrb.mxu2 %v2321_v42  ;;  %1435 = vmatpush.msrb.mxu3 %v2325_v43 }
 0x34b   :  { %1376 = vmatpush.msrb.mxu0 %v2329_v44  ;;  %1396 = vmatpush.msrb.mxu1 %v2331_v45  ;;  %v957_v45 = vld [vmem:[#allocation2 + $0xb0] sm:$0xff] }
 0x34c   :  { %1416 = vmatpush.msrb.mxu2 %v2333_v46  ;;  %1436 = vmatpush.msrb.mxu3 %v2337_v47  ;;  %v958_v46 = vld [vmem:[#allocation2 + $0xb8] sm:$0xff] }
 0x34d   :  { %1377 = vmatpush.msrb.mxu0 %v2341_v50  ;;  %1397 = vmatpush.msrb.mxu1 %v2343_v55 }
 0x34e   :  { %1417 = vmatpush.msrb.mxu2 %v2345_v59  ;;  %1437 = vmatpush.msrb.mxu3 %v2349_v60 }
 0x34f   :  { %1378 = vmatpush.msrb.mxu0 %v2353_v53  ;;  %1398 = vmatpush.msrb.mxu1 %v2355_v54 }
 0x350   :  { %1418 = vmatpush.msrb.mxu2 %v2357_v58  ;;  %1438 = vmatpush.msrb.mxu3 %v2361_v56 }
 0x351   :  { %1379 = vmatpush.msrb.mxu0 %v2365_v48  ;;  %1399 = vmatpush.msrb.mxu1 %v2367_v57 }
 0x352   :  { %1419 = vmatpush.msrb.mxu2 %v2369_v63  ;;  %1439 = vmatpush.msrb.mxu3 %v2373_v62 }
 0x353   :  { %1380 = vmatpush.msrb.mxu0 %v2792_v51  ;;  %1400 = vmatpush.msrb.mxu1 %v2793_v52 }
 0x354   :  { %1420 = vmatpush.msrb.mxu2 %v2794_v49  ;;  %1440 = vmatpush.msrb.mxu3 %v2795_v20 }
 0x355   :  { %1381 = vmatpush.msrb.mxu0 %v2796_v21  ;;  %1401 = vmatpush.msrb.mxu1 %v2797_v22 }
 0x356   :  { %1421 = vmatpush.msrb.mxu2 %v2798_v23  ;;  %1441 = vmatpush.msrb.mxu3 %v2799_v24 }
 0x357   :  { %1382 = vmatpush.msrb.mxu0 %v2800_v25  ;;  %1402 = vmatpush.msrb.mxu1 %v2801_v26 }
 0x358   :  { %1422 = vmatpush.msrb.mxu2 %v2802_v27  ;;  %1442 = vmatpush.msrb.mxu3 %v2803_v28 }
 0x359   :  { %1383 = vmatpush.msrb.mxu0 %v2804_v29  ;;  %1403 = vmatpush.msrb.mxu1 %v2805_v30 }
 0x35a   :  { %1423 = vmatpush.msrb.mxu2 %v2806_v31  ;;  %1443 = vmatpush.msrb.mxu3 %v2807_v32 }
 0x35b   :  { %1384 = vmatpush.msrb.mxu0 %v2808_v33  ;;  %1404 = vmatpush.msrb.mxu1 %v2809_v34  ;;  %v1301_v33 = vld [vmem:[#allocation2 + $0xe0] sm:$0xff]  ;;  %v1302_v34 = vld [vmem:[#allocation2 + $0xe8] sm:$0xff] }
 0x35c   :  { %1424 = vmatpush.msrb.mxu2 %v2810_v35  ;;  %1444 = vmatpush.msrb.mxu3 %v2811_v36 }
 0x3b8   :  { %v1040_v39 = vpop.f32.mrf.mxu0  ;;  %v1060_v40 = vpop.f32.mrf.mxu1 }
 0x3b9   :  { %v1103_v41 = vadd.f32 %v1040_v39, %v955_v37  ;;  %v1104_v42 = vadd.f32 %v1060_v40, %v956_v38 }
 0x3bb   :  { %v1107_v43 = vmul.f32 0.5, %v1103_v41  ;;  %v1111_v44 = vmul.f32 0.5, %v1104_v42  ;;  %v1303_v41 = vld [vmem:[#allocation2 + $0xf0] sm:$0xff]  ;;  %v1304_v42 = vld [vmem:[#allocation2 + $0xf8] sm:$0xff] }
 0x3bd   :  { %1588 = vtanh.f32 %v1107_v43 }
 0x3be   :  { %1590 = vtanh.f32 %v1111_v44 }
 0x3bf   :  { %v1080_v47 = vpop.f32.mrf.mxu2  ;;  %v1100_v50 = vpop.f32.mrf.mxu3 }
 0x3c0   :  { %v1105_v55 = vadd.f32 %v1080_v47, %v957_v45  ;;  %v1106_v59 = vadd.f32 %v1100_v50, %v958_v46 }
 0x3c2   :  { %1592 = vtanh.f32 %v1105_v55  ;;  %v1116_v60 = vmul.f32 0.5, %v1106_v59 }
 0x3c3   :  { %v1589_v53 = vpop.eup %1588 }
 0x3c4   :  { %v1591_v54 = vpop.eup %1590  ;;  %v1109_v58 = vadd.f32 1.0, %v1589_v53  ;;  %1594 = vtanh.f32 %v1116_v60 }
 0x3c5   :  { %v1113_v56 = vadd.f32 1.0, %v1591_v54 }
 0x3c6   :  { %v1110_v48 = vmul.f32 0.5, %v1109_v58 }
 0x3c7   :  { %v1114_v57 = vmul.f32 0.5, %v1113_v56 }
 0x3c8   :  { %v1593_v63 = vpop.eup %1592 }
 0x3c9   :  { %v1120_v62 = vmul.f32 %v1114_v57, %v2570_v11  ;;  %v1121_v0 = vmul.f32 %v1593_v63, %v1110_v48  ;;  %v1131_v11 = vld [vmem:[#allocation2 + $0xd8] sm:$0xff] }
 0x3ca   :  { %v1595_v1 = vpop.eup %1594 }
 0x3cb   :  { %v1122_v2 = vadd.f32 %v1121_v0, %v1120_v62  ;;  %v1118_v3 = vadd.f32 1.0, %v1595_v1 }
 0x3cd   :  { %1596 = vtanh.f32 %v1122_v2  ;;  %v1119_v8 = vmul.f32 0.5, %v1118_v3 }
 0x3d3   :  { %v1597_v19 = vpop.eup %1596 }
 0x3d4   :  { %v1124_v18 = vmul.f32 %v1597_v19, %v1119_v8 }
 0x3d6   :  { %1126 = vst [vmem:[#allocation10 + $0x28] sm:$0xff] %v1124_v18  ;;  %1212 = vmatmul.f32.vlgmr.msra.gmra.mxu0 %v1124_v18  ;;  %1232 = vmatmul.f32.vlgmr.msra.gmra.mxu1 %v1124_v18 }
 0x3d7   :  { %1252 = vmatmul.f32.vlgmr.msra.gmra.mxu2 %v1124_v18  ;;  %1272 = vmatmul.f32.vlgmr.msra.gmra.mxu3 %v1124_v18 }
 0x453   :  { %v1213_v15 = vpop.f32.mrf.mxu0  ;;  %v1233_v9 = vpop.f32.mrf.mxu1 }
 0x454   :  { %v1276_v10 = vadd.f32 %v1213_v15, %v1128_v61  ;;  %v1277_v16 = vadd.f32 %v1233_v9, %v1129_v12 }
 0x456   :  { %v1280_v14 = vmul.f32 0.5, %v1276_v10  ;;  %v1284_v6 = vmul.f32 0.5, %v1277_v16 }
 0x458   :  { %1598 = vtanh.f32 %v1280_v14 }
 0x459   :  { %1600 = vtanh.f32 %v1284_v6 }
 0x45a   :  { %v1253_v13 = vpop.f32.mrf.mxu2  ;;  %v1273_v5 = vpop.f32.mrf.mxu3 }
 0x45b   :  { %v1278_v4 = vadd.f32 %v1253_v13, %v1130_v17  ;;  %v1279_v7 = vadd.f32 %v1273_v5, %v1131_v11 }
 0x45d   :  { %1602 = vtanh.f32 %v1278_v4  ;;  %v1289_v51 = vmul.f32 0.5, %v1279_v7 }
 0x45e   :  { %v1599_v52 = vpop.eup %1598 }
 0x45f   :  { %v1601_v49 = vpop.eup %1600  ;;  %v1282_v20 = vadd.f32 1.0, %v1599_v52  ;;  %1604 = vtanh.f32 %v1289_v51 }
 0x460   :  { %v1286_v21 = vadd.f32 1.0, %v1601_v49 }
 0x461   :  { %v1283_v22 = vmul.f32 0.5, %v1282_v20 }
 0x462   :  { %v1287_v23 = vmul.f32 0.5, %v1286_v21 }
 0x463   :  { %v1603_v24 = vpop.eup %1602 }
 0x464   :  { %v1293_v25 = vmul.f32 %v1287_v23, %v1122_v2  ;;  %v1294_v26 = vmul.f32 %v1603_v24, %v1283_v22 }
 0x465   :  { %v1605_v27 = vpop.eup %1604 }
 0x466   :  { %v1295_v28 = vadd.f32 %v1294_v26, %v1293_v25  ;;  %v1291_v29 = vadd.f32 1.0, %v1605_v27 }
 0x468   :  { %1606 = vtanh.f32 %v1295_v28  ;;  %v1292_v30 = vmul.f32 0.5, %v1291_v29 }
 0x46e   :  { %v1607_v31 = vpop.eup %1606 }
 0x46f   :  { %v1297_v32 = vmul.f32 %v1607_v31, %v1292_v30 }
 0x471   :  { %1299 = vst [vmem:[#allocation10 + $0x30] sm:$0xff] %v1297_v32  ;;  %1385 = vmatmul.f32.vlgmr.msrb.gmra.mxu0 %v1297_v32  ;;  %1405 = vmatmul.f32.vlgmr.msrb.gmra.mxu1 %v1297_v32 }
 0x472   :  { %1425 = vmatmul.f32.vlgmr.msrb.gmra.mxu2 %v1297_v32  ;;  %1445 = vmatmul.f32.vlgmr.msrb.gmra.mxu3 %v1297_v32 }
 0x4ee   :  { %v1386_v35 = vpop.f32.mrf.mxu0  ;;  %v1406_v36 = vpop.f32.mrf.mxu1 }
 0x4ef   :  { %v1449_v37 = vadd.f32 %v1386_v35, %v1301_v33  ;;  %v1450_v38 = vadd.f32 %v1406_v36, %v1302_v34 }
 0x4f1   :  { %v1453_v39 = vmul.f32 0.5, %v1449_v37  ;;  %v1457_v40 = vmul.f32 0.5, %v1450_v38 }
 0x4f3   :  { %1608 = vtanh.f32 %v1453_v39 }
 0x4f4   :  { %1610 = vtanh.f32 %v1457_v40 }
 0x4f5   :  { %v1426_v43 = vpop.f32.mrf.mxu2  ;;  %v1446_v44 = vpop.f32.mrf.mxu3 }
 0x4f6   :  { %v1451_v45 = vadd.f32 %v1426_v43, %v1303_v41  ;;  %v1452_v46 = vadd.f32 %v1446_v44, %v1304_v42 }
 0x4f8   :  { %1612 = vtanh.f32 %v1451_v45  ;;  %v1462_v47 = vmul.f32 0.5, %v1452_v46 }
 0x4f9   :  { %v1609_v50 = vpop.eup %1608 }
 0x4fa   :  { %v1611_v55 = vpop.eup %1610  ;;  %v1455_v59 = vadd.f32 1.0, %v1609_v50  ;;  %1614 = vtanh.f32 %v1462_v47 }
 0x4fb   :  { %v1459_v60 = vadd.f32 1.0, %v1611_v55 }
 0x4fc   :  { %v1456_v53 = vmul.f32 0.5, %v1455_v59 }
 0x4fd   :  { %v1460_v54 = vmul.f32 0.5, %v1459_v60 }
 0x4fe   :  { %v1613_v58 = vpop.eup %1612 }
 0x4ff   :  { %v1466_v56 = vmul.f32 %v1460_v54, %v1295_v28  ;;  %v1467_v48 = vmul.f32 %v1613_v58, %v1456_v53 }
 0x500   :  { %v1615_v57 = vpop.eup %1614 }
 0x501   :  { %v1468_v63 = vadd.f32 %v1467_v48, %v1466_v56  ;;  %v1464_v62 = vadd.f32 1.0, %v1615_v57 }
 0x503   :  { %1616 = vtanh.f32 %v1468_v63  ;;  %1474 = vst [vmem:[#allocation13] sm:$0xff] %v1468_v63  ;;  %v1465_v0 = vmul.f32 0.5, %v1464_v62 }
 0x509   :  { %v1617_v1 = vpop.eup %1616 }
 0x50a   :  { %v1470_v2 = vmul.f32 %v1617_v1, %v1465_v0 }
 0x50c   :  { %1472 = vst [vmem:[#allocation10 + $0x38] sm:$0xff] %v1470_v2 }
 0x50d   :  { %1473 = vst [vmem:[#allocation11] sm:$0xff] %v1470_v2  ;;  %1487 = dma.vmem_to_hbm [thread:$0]  %s1480_s3, 1024, %s1482_s19, [#allocation4], %s1805_s4, %s1805_s4, %s1806_s30  }
 0x50e   :  { %1498 = dma.vmem_to_hbm [thread:$0]  %s1494_s21, 128, %s1496_s24, [#allocation12]  }
 0x50f   :  { %1509 = dma.vmem_to_hbm [thread:$0]  %s1505_s26, 128, %s1507_s29, [#allocation12]  }
 0x510   :  { %1792 = dma.done.wait [#allocation4], 1024  }
 0x511   :  { %1793 = vsyncadd [#allocation4], 4294966272 }
 0x512   :  { %1794 = dma.done.wait [#allocation12], 256  }
 0x513   :  { %1795 = vsyncadd [#allocation12], 4294967040 }
 0x514   :  { %1522 = vsyncpa [#allocation3], 1 }
 0x515   :  { %1523 = vsyncpa [#allocation6], 1 }
 0x516   :  { %1524 = vsyncpa [#allocation9], 1 }
 0x517   :  { %1525 = vsyncpa [#allocation4], 1 }
 0x518   :  { %1526 = vsyncpa [#allocation12], 1 }

</bundles_post_ra>
